<compile_context>
chip_gen: v6e
topology: v6e:2x2x1
jax: 0.10.0
libtpu: 0.0.40
codegen_flags: <defaults>
</compile_context>

<pallas_src>
import functools

import jax
import jax.numpy as jnp
from jax.experimental import pallas as pl
from jax.experimental.pallas import tpu as pltpu

C_PAD = 128  # lane width: every channel dim is zero-padded to this


# ----------------------------------------------------------------------------
# Kernel
# ----------------------------------------------------------------------------
def _postnet_kernel(x_ref, w_ref, shift_ref, *rest,
                    layer_cfg, t_len, halo, training):
    """Fused postnet for one batch element (grid axis 0 = batch).

    x_ref    : (1, T, C_mel)                 f32   input block
    w_ref    : (L, K_max, 128, 128)          bf16  folded conv*BN weights
    shift_ref: (L, 128)                      f32   folded bias/BN shift
    bits_ref : (L, 1, T, 128)                i32   dropout words (training only)
    o_ref    : (1, T, 128)                   f32   lane-dense output block
    buf_a/b  : (T + 2*halo, 128)             f32   ping-pong activation scratch
    """
    if training:
        bits_ref, o_ref, buf_a, buf_b = rest
    else:
        bits_ref = None
        o_ref, buf_a, buf_b = rest

    # Halo rows and padded channel lanes must be exactly zero ("same" conv with
    # zero padding); scratch persists across grid steps, so clear every step.
    buf_a[...] = jnp.zeros_like(buf_a)
    buf_b[...] = jnp.zeros_like(buf_b)

    # Copy this batch element's [T, C_in] slab into the centre of buffer A.
    c_in0 = x_ref.shape[-1]
    buf_a[pl.ds(halo, t_len), pl.ds(0, c_in0)] = x_ref[0]

    src, dst = buf_a, buf_b
    for l, (k_size, pad, with_tanh) in enumerate(layer_cfg):
        acc = jnp.zeros((t_len, C_PAD), jnp.float32)
        base = halo - pad
        for k in range(k_size):                      # conv1d = K shifted matmuls
            xin = src[pl.ds(base + k, t_len), :]
            acc = acc + jnp.dot(xin.astype(jnp.bfloat16),
                                w_ref[l, k],
                                preferred_element_type=jnp.float32)
        acc = acc + shift_ref[pl.ds(l, 1), :]        # folded conv-bias + BN shift
        if with_tanh:
            acc = jnp.tanh(acc)
        if training:
            bits = bits_ref[l, 0]                    # (T, 128) int32 random words
            keep = bits >= 0                         # MSB == 0  ->  p = 1/2
            acc = jnp.where(keep, acc, 0.0) * 2.0    # folded 1/(1-p) scale
        dst[pl.ds(halo, t_len), :] = acc
        src, dst = dst, src

    o_ref[0] = src[pl.ds(halo, t_len), :].astype(o_ref.dtype)


# ----------------------------------------------------------------------------
# Wrapper
# ----------------------------------------------------------------------------
def tctrn_postnet_forward(x_bct, params, dropout_bits=None):
    """x_bct: [B, C_mel, T] f32 (PyTorch Conv1d layout) -> [B, C_mel, T] f32.

    dropout_bits: None for eval mode (dropout inactive), or a uint32 array of
    shape [n_layers, B, T, 128] of random words for training-mode dropout.
    """
    w_packed, shift_packed, layer_cfg, channels = params
    training = dropout_bits is not None
    b, c_mel, t = x_bct.shape
    n_layers, k_max = w_packed.shape[:2]
    halo = max(max(pad, k - 1 - pad) for (k, pad, _) in layer_cfg)

    x_btc = jnp.transpose(x_bct, (0, 2, 1)).astype(jnp.float32)   # [B, T, C]

    operands = [x_btc, w_packed, shift_packed]
    in_specs = [
        pl.BlockSpec((1, t, c_mel), lambda i: (i, 0, 0)),                    # x
        pl.BlockSpec((n_layers, k_max, C_PAD, C_PAD), lambda i: (0, 0, 0, 0)),  # W (resident)
        pl.BlockSpec((n_layers, C_PAD), lambda i: (0, 0)),                   # shift (resident)
    ]
    if training:
        bits_i32 = jax.lax.bitcast_convert_type(dropout_bits, jnp.int32)
        operands.append(bits_i32)
        in_specs.append(
            pl.BlockSpec((n_layers, 1, t, C_PAD), lambda i: (0, i, 0, 0)))

    kernel = functools.partial(
        _postnet_kernel, layer_cfg=tuple(layer_cfg), t_len=t, halo=halo,
        training=training)

    out = pl.pallas_call(
        kernel,
        out_shape=jax.ShapeDtypeStruct((b, t, C_PAD), jnp.float32),
        grid=(b,),
        in_specs=in_specs,
        out_specs=pl.BlockSpec((1, t, C_PAD), lambda i: (i, 0, 0)),
        scratch_shapes=[
            pltpu.VMEM((t + 2 * halo, C_PAD), jnp.float32),
            pltpu.VMEM((t + 2 * halo, C_PAD), jnp.float32),
        ],
        compiler_params=pltpu.CompilerParams(
            dimension_semantics=("parallel",)),
    )(*operands)

    out = out[:, :, :channels[-1]]                   # drop padded lanes
    return jnp.transpose(out, (0, 2, 1))             # back to [B, C, T]


# ----------------------------------------------------------------------------
# Parameter construction (conv + BN, folded & packed for the kernel)
# ----------------------------------------------------------------------------
def init_postnet_params(key, n_mel, embd_dim, kernel_size, n_conv):
    """Deterministic conv/BN params, BN folded (running stats), packed to 128 lanes."""
    channels = [n_mel] + [embd_dim] * (n_conv - 1) + [n_mel]
    layer_cfg = []
    w_packed = jnp.zeros((n_conv, kernel_size, C_PAD, C_PAD), jnp.float32)
    shift_packed = jnp.zeros((n_conv, C_PAD), jnp.float32)
    eps = 1e-5
    for l in range(n_conv):
        c_in, c_out = channels[l], channels[l + 1]
        k, pad = kernel_size, (kernel_size - 1) // 2
        with_tanh = l < n_conv - 1
        layer_cfg.append((k, pad, with_tanh))

        kw, kb, kg, kbe, km, kv = jax.random.split(jax.random.fold_in(key, l), 6)
        gain = 5.0 / 3.0                               # xavier_uniform, tanh gain
        limit = gain * (6.0 / (c_in * k + c_out * k)) ** 0.5
        w = jax.random.uniform(kw, (c_out, c_in, k), jnp.float32, -limit, limit)
        bias = jax.random.uniform(kb, (c_out,), jnp.float32, -0.1, 0.1)
        gamma = jax.random.uniform(kg, (c_out,), jnp.float32, 0.5, 1.5)
        beta = 0.1 * jax.random.normal(kbe, (c_out,), jnp.float32)
        mean = 0.1 * jax.random.normal(km, (c_out,), jnp.float32)
        var = jax.random.uniform(kv, (c_out,), jnp.float32, 0.5, 1.5)

        scale = gamma / jnp.sqrt(var + eps)            # fold BN into conv
        w_fold = w * scale[:, None, None]              # [C_out, C_in, K]
        shift = (bias - mean) * scale + beta           # [C_out]

        w_k = jnp.transpose(w_fold, (2, 1, 0))         # [K, C_in, C_out] for x @ W
        w_packed = w_packed.at[l, :k, :c_in, :c_out].set(w_k)
        shift_packed = shift_packed.at[l, :c_out].set(shift)

    return (w_packed.astype(jnp.bfloat16), shift_packed,
            tuple(layer_cfg), tuple(channels))


# ----------------------------------------------------------------------------
# Pure-JAX reference (same math, same bf16 casts) for validation
# ----------------------------------------------------------------------------
def postnet_reference(x_bct, params, dropout_bits=None):
    w_packed, shift_packed, layer_cfg, channels = params
    b, c_mel, t = x_bct.shape
    h = jnp.zeros((b, t, C_PAD), jnp.float32)
    h = h.at[:, :, :c_mel].set(jnp.transpose(x_bct, (0, 2, 1)))
    bits_i32 = (None if dropout_bits is None
                else jax.lax.bitcast_convert_type(dropout_bits, jnp.int32))
    for l, (k_size, pad, with_tanh) in enumerate(layer_cfg):
        hp = jnp.pad(h, ((0, 0), (pad, pad), (0, 0)))
        acc = jnp.zeros((b, t, C_PAD), jnp.float32)
        for k in range(k_size):
            acc = acc + jnp.einsum(
                "btc,cd->btd",
                hp[:, k:k + t, :].astype(jnp.bfloat16),
                w_packed[l, k],
                preferred_element_type=jnp.float32)
        acc = acc + shift_packed[l][None, None, :]
        if with_tanh:
            acc = jnp.tanh(acc)
        if bits_i32 is not None:
            acc = jnp.where(bits_i32[l] >= 0, acc, 0.0) * 2.0
        h = acc
    return jnp.transpose(h[:, :, :channels[-1]], (0, 2, 1))


# ----------------------------------------------------------------------------
# Demo / self-test
# ----------------------------------------------------------------------------
if __name__ == "__main__":
    key = jax.random.PRNGKey(0)
    kx, kp, kd = jax.random.split(key, 3)

    # Small shapes consistent with the module: batch=2, n_mel=16 channels,
    # seq=24 frames, postnet embedding dim 32, kernel size 5, 3 conv blocks.
    B, N_MEL, T = 2, 16, 24
    EMBD, KSIZE, N_CONV = 32, 5, 3

    x = jax.random.normal(kx, (B, N_MEL, T), jnp.float32)   # [B, C, T] (Conv1d layout)
    params = init_postnet_params(kp, N_MEL, EMBD, KSIZE, N_CONV)

    # --- eval mode (self.training == False: dropout is identity) ---
    out_eval = jax.block_until_ready(tctrn_postnet_forward(x, params))
    ref_eval = postnet_reference(x, params)
    assert out_eval.shape == (B, N_MEL, T), out_eval.shape
    assert bool(jnp.isfinite(out_eval).all())
    assert bool(jnp.allclose(out_eval, ref_eval, atol=2e-2, rtol=2e-2))

    # --- training mode (self.training == True: p=0.5 dropout on every block) ---
    bits = jax.random.bits(kd, (N_CONV, B, T, C_PAD), jnp.uint32)
    out_trn = jax.block_until_ready(
        tctrn_postnet_forward(x, params, dropout_bits=bits))
    ref_trn = postnet_reference(x, params, dropout_bits=bits)
    assert out_trn.shape == (B, N_MEL, T), out_trn.shape
    assert bool(jnp.isfinite(out_trn).all())
    assert bool(jnp.allclose(out_trn, ref_trn, atol=2e-2, rtol=2e-2))

    print("KERNEL_OK")
</pallas_src>

<mosaic_0001>
module attributes {stable_mosaic.version = 11 : i64} {
  func.func @_postnet_kernel(%arg0: i32, %arg1: memref<1x24x16xf32, #tpu.memory_space<vmem>>, %arg2: memref<3x5x128x128xbf16, #tpu.memory_space<vmem>>, %arg3: memref<3x128xf32, #tpu.memory_space<vmem>>, %arg4: memref<1x24x128xf32, #tpu.memory_space<vmem>>, %arg5: memref<28x128xf32, #tpu.memory_space<vmem>>, %arg6: memref<28x128xf32, #tpu.memory_space<vmem>>) attributes {dimension_semantics = [#tpu.dimension_semantics<parallel>], iteration_bounds = array<i64: 2>, scalar_prefetch = 0 : i64, scratch_operands = 2 : i64, tpu.core_type = #tpu.core_type<tc>, window_params = [{transform_indices = @transform_0, window_bounds = array<i64: 1, 24, 16>}, {pipeline_mode = #tpu.pipeline_mode<synchronous>, transform_indices = @transform_1, window_bounds = array<i64: 3, 5, 128, 128>}, {pipeline_mode = #tpu.pipeline_mode<synchronous>, transform_indices = @transform_2, window_bounds = array<i64: 3, 128>}, {transform_indices = @transform_3, window_bounds = array<i64: 1, 24, 128>}]} {
    %cst = arith.constant 0.000000e+00 : f32
    %0 = vector.broadcast %cst : f32 to vector<28x128xf32>
    %c0 = arith.constant 0 : index
    %c0_0 = arith.constant 0 : index
    %1 = vector.load %arg5[%c0, %c0_0] : memref<28x128xf32, #tpu.memory_space<vmem>>, vector<28x128xf32>
    tpu.vector_store %arg5[%c0, %c0_0], %0 {strides = array<i32>} : memref<28x128xf32, #tpu.memory_space<vmem>>, vector<28x128xf32>,
    %cst_1 = arith.constant 0.000000e+00 : f32
    %2 = vector.broadcast %cst_1 : f32 to vector<28x128xf32>
    %c0_2 = arith.constant 0 : index
    %c0_3 = arith.constant 0 : index
    %3 = vector.load %arg6[%c0_2, %c0_3] : memref<28x128xf32, #tpu.memory_space<vmem>>, vector<28x128xf32>
    tpu.vector_store %arg6[%c0_2, %c0_3], %2 {strides = array<i32>} : memref<28x128xf32, #tpu.memory_space<vmem>>, vector<28x128xf32>,
    %c0_4 = arith.constant 0 : index
    %c0_5 = arith.constant 0 : index
    %c0_6 = arith.constant 0 : index
    %4 = vector.load %arg1[%c0_4, %c0_5, %c0_6] : memref<1x24x16xf32, #tpu.memory_space<vmem>>, vector<1x24x16xf32>
    %5 = vector.shape_cast %4 : vector<1x24x16xf32> to vector<24x16xf32>
    %c2 = arith.constant 2 : index
    %c0_7 = arith.constant 0 : index
    %6 = vector.load %arg5[%c2, %c0_7] : memref<28x128xf32, #tpu.memory_space<vmem>>, vector<24x16xf32>
    tpu.vector_store %arg5[%c2, %c0_7], %5 {strides = array<i32>} : memref<28x128xf32, #tpu.memory_space<vmem>>, vector<24x16xf32>,
    %cst_8 = arith.constant 0.000000e+00 : f32
    %7 = vector.broadcast %cst_8 : f32 to vector<24x128xf32>
    %c0_9 = arith.constant 0 : index
    %c0_10 = arith.constant 0 : index
    %8 = vector.load %arg5[%c0_9, %c0_10] : memref<28x128xf32, #tpu.memory_space<vmem>>, vector<24x128xf32>
    %9 = arith.truncf %8 : vector<24x128xf32> to vector<24x128xbf16>
    %c0_11 = arith.constant 0 : index
    %c0_12 = arith.constant 0 : index
    %c0_13 = arith.constant 0 : index
    %c0_14 = arith.constant 0 : index
    %10 = vector.load %arg2[%c0_11, %c0_12, %c0_13, %c0_14] : memref<3x5x128x128xbf16, #tpu.memory_space<vmem>>, vector<1x1x128x128xbf16>
    %11 = vector.shape_cast %10 : vector<1x1x128x128xbf16> to vector<128x128xbf16>
    %cst_15 = arith.constant dense<0.000000e+00> : vector<24x128xf32>
    %12 = tpu.matmul %9, %11, %cst_15 {dimension_numbers = #tpu.dot_dimension_numbers<[1], [0], [0], [1], [0, 0, 1, 1], [], []>} : vector<24x128xbf16>, vector<128x128xbf16>, vector<24x128xf32> -> vector<24x128xf32>
    %13 = arith.addf %7, %12 : vector<24x128xf32>
    %c1 = arith.constant 1 : index
    %c0_16 = arith.constant 0 : index
    %14 = vector.load %arg5[%c1, %c0_16] : memref<28x128xf32, #tpu.memory_space<vmem>>, vector<24x128xf32>
    %15 = arith.truncf %14 : vector<24x128xf32> to vector<24x128xbf16>
    %c0_17 = arith.constant 0 : index
    %c1_18 = arith.constant 1 : index
    %c0_19 = arith.constant 0 : index
    %c0_20 = arith.constant 0 : index
    %16 = vector.load %arg2[%c0_17, %c1_18, %c0_19, %c0_20] : memref<3x5x128x128xbf16, #tpu.memory_space<vmem>>, vector<1x1x128x128xbf16>
    %17 = vector.shape_cast %16 : vector<1x1x128x128xbf16> to vector<128x128xbf16>
    %cst_21 = arith.constant dense<0.000000e+00> : vector<24x128xf32>
    %18 = tpu.matmul %15, %17, %cst_21 {dimension_numbers = #tpu.dot_dimension_numbers<[1], [0], [0], [1], [0, 0, 1, 1], [], []>} : vector<24x128xbf16>, vector<128x128xbf16>, vector<24x128xf32> -> vector<24x128xf32>
    %19 = arith.addf %13, %18 : vector<24x128xf32>
    %c2_22 = arith.constant 2 : index
    %c0_23 = arith.constant 0 : index
    %20 = vector.load %arg5[%c2_22, %c0_23] : memref<28x128xf32, #tpu.memory_space<vmem>>, vector<24x128xf32>
    %21 = arith.truncf %20 : vector<24x128xf32> to vector<24x128xbf16>
    %c0_24 = arith.constant 0 : index
    %c2_25 = arith.constant 2 : index
    %c0_26 = arith.constant 0 : index
    %c0_27 = arith.constant 0 : index
    %22 = vector.load %arg2[%c0_24, %c2_25, %c0_26, %c0_27] : memref<3x5x128x128xbf16, #tpu.memory_space<vmem>>, vector<1x1x128x128xbf16>
    %23 = vector.shape_cast %22 : vector<1x1x128x128xbf16> to vector<128x128xbf16>
    %cst_28 = arith.constant dense<0.000000e+00> : vector<24x128xf32>
    %24 = tpu.matmul %21, %23, %cst_28 {dimension_numbers = #tpu.dot_dimension_numbers<[1], [0], [0], [1], [0, 0, 1, 1], [], []>} : vector<24x128xbf16>, vector<128x128xbf16>, vector<24x128xf32> -> vector<24x128xf32>
    %25 = arith.addf %19, %24 : vector<24x128xf32>
    %c3 = arith.constant 3 : index
    %c0_29 = arith.constant 0 : index
    %26 = vector.load %arg5[%c3, %c0_29] : memref<28x128xf32, #tpu.memory_space<vmem>>, vector<24x128xf32>
    %27 = arith.truncf %26 : vector<24x128xf32> to vector<24x128xbf16>
    %c0_30 = arith.constant 0 : index
    %c3_31 = arith.constant 3 : index
    %c0_32 = arith.constant 0 : index
    %c0_33 = arith.constant 0 : index
    %28 = vector.load %arg2[%c0_30, %c3_31, %c0_32, %c0_33] : memref<3x5x128x128xbf16, #tpu.memory_space<vmem>>, vector<1x1x128x128xbf16>
    %29 = vector.shape_cast %28 : vector<1x1x128x128xbf16> to vector<128x128xbf16>
    %cst_34 = arith.constant dense<0.000000e+00> : vector<24x128xf32>
    %30 = tpu.matmul %27, %29, %cst_34 {dimension_numbers = #tpu.dot_dimension_numbers<[1], [0], [0], [1], [0, 0, 1, 1], [], []>} : vector<24x128xbf16>, vector<128x128xbf16>, vector<24x128xf32> -> vector<24x128xf32>
    %31 = arith.addf %25, %30 : vector<24x128xf32>
    %c4 = arith.constant 4 : index
    %c0_35 = arith.constant 0 : index
    %32 = vector.load %arg5[%c4, %c0_35] : memref<28x128xf32, #tpu.memory_space<vmem>>, vector<24x128xf32>
    %33 = arith.truncf %32 : vector<24x128xf32> to vector<24x128xbf16>
    %c0_36 = arith.constant 0 : index
    %c4_37 = arith.constant 4 : index
    %c0_38 = arith.constant 0 : index
    %c0_39 = arith.constant 0 : index
    %34 = vector.load %arg2[%c0_36, %c4_37, %c0_38, %c0_39] : memref<3x5x128x128xbf16, #tpu.memory_space<vmem>>, vector<1x1x128x128xbf16>
    %35 = vector.shape_cast %34 : vector<1x1x128x128xbf16> to vector<128x128xbf16>
    %cst_40 = arith.constant dense<0.000000e+00> : vector<24x128xf32>
    %36 = tpu.matmul %33, %35, %cst_40 {dimension_numbers = #tpu.dot_dimension_numbers<[1], [0], [0], [1], [0, 0, 1, 1], [], []>} : vector<24x128xbf16>, vector<128x128xbf16>, vector<24x128xf32> -> vector<24x128xf32>
    %37 = arith.addf %31, %36 : vector<24x128xf32>
    %c0_41 = arith.constant 0 : index
    %c0_42 = arith.constant 0 : index
    %38 = vector.load %arg3[%c0_41, %c0_42] : memref<3x128xf32, #tpu.memory_space<vmem>>, vector<1x128xf32>
    %39 = vector.broadcast %38 : vector<1x128xf32> to vector<24x128xf32>
    %40 = arith.addf %37, %39 : vector<24x128xf32>
    %41 = math.tanh %40 : vector<24x128xf32>
    %c2_43 = arith.constant 2 : index
    %c0_44 = arith.constant 0 : index
    %42 = vector.load %arg6[%c2_43, %c0_44] : memref<28x128xf32, #tpu.memory_space<vmem>>, vector<24x128xf32>
    tpu.vector_store %arg6[%c2_43, %c0_44], %41 {strides = array<i32>} : memref<28x128xf32, #tpu.memory_space<vmem>>, vector<24x128xf32>,
    %cst_45 = arith.constant 0.000000e+00 : f32
    %43 = vector.broadcast %cst_45 : f32 to vector<24x128xf32>
    %c0_46 = arith.constant 0 : index
    %c0_47 = arith.constant 0 : index
    %44 = vector.load %arg6[%c0_46, %c0_47] : memref<28x128xf32, #tpu.memory_space<vmem>>, vector<24x128xf32>
    %45 = arith.truncf %44 : vector<24x128xf32> to vector<24x128xbf16>
    %c1_48 = arith.constant 1 : index
    %c0_49 = arith.constant 0 : index
    %c0_50 = arith.constant 0 : index
    %c0_51 = arith.constant 0 : index
    %46 = vector.load %arg2[%c1_48, %c0_49, %c0_50, %c0_51] : memref<3x5x128x128xbf16, #tpu.memory_space<vmem>>, vector<1x1x128x128xbf16>
    %47 = vector.shape_cast %46 : vector<1x1x128x128xbf16> to vector<128x128xbf16>
    %cst_52 = arith.constant dense<0.000000e+00> : vector<24x128xf32>
    %48 = tpu.matmul %45, %47, %cst_52 {dimension_numbers = #tpu.dot_dimension_numbers<[1], [0], [0], [1], [0, 0, 1, 1], [], []>} : vector<24x128xbf16>, vector<128x128xbf16>, vector<24x128xf32> -> vector<24x128xf32>
    %49 = arith.addf %43, %48 : vector<24x128xf32>
    %c1_53 = arith.constant 1 : index
    %c0_54 = arith.constant 0 : index
    %50 = vector.load %arg6[%c1_53, %c0_54] : memref<28x128xf32, #tpu.memory_space<vmem>>, vector<24x128xf32>
    %51 = arith.truncf %50 : vector<24x128xf32> to vector<24x128xbf16>
    %c1_55 = arith.constant 1 : index
    %c1_56 = arith.constant 1 : index
    %c0_57 = arith.constant 0 : index
    %c0_58 = arith.constant 0 : index
    %52 = vector.load %arg2[%c1_55, %c1_56, %c0_57, %c0_58] : memref<3x5x128x128xbf16, #tpu.memory_space<vmem>>, vector<1x1x128x128xbf16>
    %53 = vector.shape_cast %52 : vector<1x1x128x128xbf16> to vector<128x128xbf16>
    %cst_59 = arith.constant dense<0.000000e+00> : vector<24x128xf32>
    %54 = tpu.matmul %51, %53, %cst_59 {dimension_numbers = #tpu.dot_dimension_numbers<[1], [0], [0], [1], [0, 0, 1, 1], [], []>} : vector<24x128xbf16>, vector<128x128xbf16>, vector<24x128xf32> -> vector<24x128xf32>
    %55 = arith.addf %49, %54 : vector<24x128xf32>
    %c2_60 = arith.constant 2 : index
    %c0_61 = arith.constant 0 : index
    %56 = vector.load %arg6[%c2_60, %c0_61] : memref<28x128xf32, #tpu.memory_space<vmem>>, vector<24x128xf32>
    %57 = arith.truncf %56 : vector<24x128xf32> to vector<24x128xbf16>
    %c1_62 = arith.constant 1 : index
    %c2_63 = arith.constant 2 : index
    %c0_64 = arith.constant 0 : index
    %c0_65 = arith.constant 0 : index
    %58 = vector.load %arg2[%c1_62, %c2_63, %c0_64, %c0_65] : memref<3x5x128x128xbf16, #tpu.memory_space<vmem>>, vector<1x1x128x128xbf16>
    %59 = vector.shape_cast %58 : vector<1x1x128x128xbf16> to vector<128x128xbf16>
    %cst_66 = arith.constant dense<0.000000e+00> : vector<24x128xf32>
    %60 = tpu.matmul %57, %59, %cst_66 {dimension_numbers = #tpu.dot_dimension_numbers<[1], [0], [0], [1], [0, 0, 1, 1], [], []>} : vector<24x128xbf16>, vector<128x128xbf16>, vector<24x128xf32> -> vector<24x128xf32>
    %61 = arith.addf %55, %60 : vector<24x128xf32>
    %c3_67 = arith.constant 3 : index
    %c0_68 = arith.constant 0 : index
    %62 = vector.load %arg6[%c3_67, %c0_68] : memref<28x128xf32, #tpu.memory_space<vmem>>, vector<24x128xf32>
    %63 = arith.truncf %62 : vector<24x128xf32> to vector<24x128xbf16>
    %c1_69 = arith.constant 1 : index
    %c3_70 = arith.constant 3 : index
    %c0_71 = arith.constant 0 : index
    %c0_72 = arith.constant 0 : index
    %64 = vector.load %arg2[%c1_69, %c3_70, %c0_71, %c0_72] : memref<3x5x128x128xbf16, #tpu.memory_space<vmem>>, vector<1x1x128x128xbf16>
    %65 = vector.shape_cast %64 : vector<1x1x128x128xbf16> to vector<128x128xbf16>
    %cst_73 = arith.constant dense<0.000000e+00> : vector<24x128xf32>
    %66 = tpu.matmul %63, %65, %cst_73 {dimension_numbers = #tpu.dot_dimension_numbers<[1], [0], [0], [1], [0, 0, 1, 1], [], []>} : vector<24x128xbf16>, vector<128x128xbf16>, vector<24x128xf32> -> vector<24x128xf32>
    %67 = arith.addf %61, %66 : vector<24x128xf32>
    %c4_74 = arith.constant 4 : index
    %c0_75 = arith.constant 0 : index
    %68 = vector.load %arg6[%c4_74, %c0_75] : memref<28x128xf32, #tpu.memory_space<vmem>>, vector<24x128xf32>
    %69 = arith.truncf %68 : vector<24x128xf32> to vector<24x128xbf16>
    %c1_76 = arith.constant 1 : index
    %c4_77 = arith.constant 4 : index
    %c0_78 = arith.constant 0 : index
    %c0_79 = arith.constant 0 : index
    %70 = vector.load %arg2[%c1_76, %c4_77, %c0_78, %c0_79] : memref<3x5x128x128xbf16, #tpu.memory_space<vmem>>, vector<1x1x128x128xbf16>
    %71 = vector.shape_cast %70 : vector<1x1x128x128xbf16> to vector<128x128xbf16>
    %cst_80 = arith.constant dense<0.000000e+00> : vector<24x128xf32>
    %72 = tpu.matmul %69, %71, %cst_80 {dimension_numbers = #tpu.dot_dimension_numbers<[1], [0], [0], [1], [0, 0, 1, 1], [], []>} : vector<24x128xbf16>, vector<128x128xbf16>, vector<24x128xf32> -> vector<24x128xf32>
    %73 = arith.addf %67, %72 : vector<24x128xf32>
    %c1_81 = arith.constant 1 : index
    %c0_82 = arith.constant 0 : index
    %74 = vector.load %arg3[%c1_81, %c0_82] : memref<3x128xf32, #tpu.memory_space<vmem>>, vector<1x128xf32>
    %75 = vector.broadcast %74 : vector<1x128xf32> to vector<24x128xf32>
    %76 = arith.addf %73, %75 : vector<24x128xf32>
    %77 = math.tanh %76 : vector<24x128xf32>
    %c2_83 = arith.constant 2 : index
    %c0_84 = arith.constant 0 : index
    %78 = vector.load %arg5[%c2_83, %c0_84] : memref<28x128xf32, #tpu.memory_space<vmem>>, vector<24x128xf32>
    tpu.vector_store %arg5[%c2_83, %c0_84], %77 {strides = array<i32>} : memref<28x128xf32, #tpu.memory_space<vmem>>, vector<24x128xf32>,
    %cst_85 = arith.constant 0.000000e+00 : f32
    %79 = vector.broadcast %cst_85 : f32 to vector<24x128xf32>
    %c0_86 = arith.constant 0 : index
    %c0_87 = arith.constant 0 : index
    %80 = vector.load %arg5[%c0_86, %c0_87] : memref<28x128xf32, #tpu.memory_space<vmem>>, vector<24x128xf32>
    %81 = arith.truncf %80 : vector<24x128xf32> to vector<24x128xbf16>
    %c2_88 = arith.constant 2 : index
    %c0_89 = arith.constant 0 : index
    %c0_90 = arith.constant 0 : index
    %c0_91 = arith.constant 0 : index
    %82 = vector.load %arg2[%c2_88, %c0_89, %c0_90, %c0_91] : memref<3x5x128x128xbf16, #tpu.memory_space<vmem>>, vector<1x1x128x128xbf16>
    %83 = vector.shape_cast %82 : vector<1x1x128x128xbf16> to vector<128x128xbf16>
    %cst_92 = arith.constant dense<0.000000e+00> : vector<24x128xf32>
    %84 = tpu.matmul %81, %83, %cst_92 {dimension_numbers = #tpu.dot_dimension_numbers<[1], [0], [0], [1], [0, 0, 1, 1], [], []>} : vector<24x128xbf16>, vector<128x128xbf16>, vector<24x128xf32> -> vector<24x128xf32>
    %85 = arith.addf %79, %84 : vector<24x128xf32>
    %c1_93 = arith.constant 1 : index
    %c0_94 = arith.constant 0 : index
    %86 = vector.load %arg5[%c1_93, %c0_94] : memref<28x128xf32, #tpu.memory_space<vmem>>, vector<24x128xf32>
    %87 = arith.truncf %86 : vector<24x128xf32> to vector<24x128xbf16>
    %c2_95 = arith.constant 2 : index
    %c1_96 = arith.constant 1 : index
    %c0_97 = arith.constant 0 : index
    %c0_98 = arith.constant 0 : index
    %88 = vector.load %arg2[%c2_95, %c1_96, %c0_97, %c0_98] : memref<3x5x128x128xbf16, #tpu.memory_space<vmem>>, vector<1x1x128x128xbf16>
    %89 = vector.shape_cast %88 : vector<1x1x128x128xbf16> to vector<128x128xbf16>
    %cst_99 = arith.constant dense<0.000000e+00> : vector<24x128xf32>
    %90 = tpu.matmul %87, %89, %cst_99 {dimension_numbers = #tpu.dot_dimension_numbers<[1], [0], [0], [1], [0, 0, 1, 1], [], []>} : vector<24x128xbf16>, vector<128x128xbf16>, vector<24x128xf32> -> vector<24x128xf32>
    %91 = arith.addf %85, %90 : vector<24x128xf32>
    %c2_100 = arith.constant 2 : index
    %c0_101 = arith.constant 0 : index
    %92 = vector.load %arg5[%c2_100, %c0_101] : memref<28x128xf32, #tpu.memory_space<vmem>>, vector<24x128xf32>
    %93 = arith.truncf %92 : vector<24x128xf32> to vector<24x128xbf16>
    %c2_102 = arith.constant 2 : index
    %c2_103 = arith.constant 2 : index
    %c0_104 = arith.constant 0 : index
    %c0_105 = arith.constant 0 : index
    %94 = vector.load %arg2[%c2_102, %c2_103, %c0_104, %c0_105] : memref<3x5x128x128xbf16, #tpu.memory_space<vmem>>, vector<1x1x128x128xbf16>
    %95 = vector.shape_cast %94 : vector<1x1x128x128xbf16> to vector<128x128xbf16>
    %cst_106 = arith.constant dense<0.000000e+00> : vector<24x128xf32>
    %96 = tpu.matmul %93, %95, %cst_106 {dimension_numbers = #tpu.dot_dimension_numbers<[1], [0], [0], [1], [0, 0, 1, 1], [], []>} : vector<24x128xbf16>, vector<128x128xbf16>, vector<24x128xf32> -> vector<24x128xf32>
    %97 = arith.addf %91, %96 : vector<24x128xf32>
    %c3_107 = arith.constant 3 : index
    %c0_108 = arith.constant 0 : index
    %98 = vector.load %arg5[%c3_107, %c0_108] : memref<28x128xf32, #tpu.memory_space<vmem>>, vector<24x128xf32>
    %99 = arith.truncf %98 : vector<24x128xf32> to vector<24x128xbf16>
    %c2_109 = arith.constant 2 : index
    %c3_110 = arith.constant 3 : index
    %c0_111 = arith.constant 0 : index
    %c0_112 = arith.constant 0 : index
    %100 = vector.load %arg2[%c2_109, %c3_110, %c0_111, %c0_112] : memref<3x5x128x128xbf16, #tpu.memory_space<vmem>>, vector<1x1x128x128xbf16>
    %101 = vector.shape_cast %100 : vector<1x1x128x128xbf16> to vector<128x128xbf16>
    %cst_113 = arith.constant dense<0.000000e+00> : vector<24x128xf32>
    %102 = tpu.matmul %99, %101, %cst_113 {dimension_numbers = #tpu.dot_dimension_numbers<[1], [0], [0], [1], [0, 0, 1, 1], [], []>} : vector<24x128xbf16>, vector<128x128xbf16>, vector<24x128xf32> -> vector<24x128xf32>
    %103 = arith.addf %97, %102 : vector<24x128xf32>
    %c4_114 = arith.constant 4 : index
    %c0_115 = arith.constant 0 : index
    %104 = vector.load %arg5[%c4_114, %c0_115] : memref<28x128xf32, #tpu.memory_space<vmem>>, vector<24x128xf32>
    %105 = arith.truncf %104 : vector<24x128xf32> to vector<24x128xbf16>
    %c2_116 = arith.constant 2 : index
    %c4_117 = arith.constant 4 : index
    %c0_118 = arith.constant 0 : index
    %c0_119 = arith.constant 0 : index
    %106 = vector.load %arg2[%c2_116, %c4_117, %c0_118, %c0_119] : memref<3x5x128x128xbf16, #tpu.memory_space<vmem>>, vector<1x1x128x128xbf16>
    %107 = vector.shape_cast %106 : vector<1x1x128x128xbf16> to vector<128x128xbf16>
    %cst_120 = arith.constant dense<0.000000e+00> : vector<24x128xf32>
    %108 = tpu.matmul %105, %107, %cst_120 {dimension_numbers = #tpu.dot_dimension_numbers<[1], [0], [0], [1], [0, 0, 1, 1], [], []>} : vector<24x128xbf16>, vector<128x128xbf16>, vector<24x128xf32> -> vector<24x128xf32>
    %109 = arith.addf %103, %108 : vector<24x128xf32>
    %c2_121 = arith.constant 2 : index
    %c0_122 = arith.constant 0 : index
    %110 = vector.load %arg3[%c2_121, %c0_122] : memref<3x128xf32, #tpu.memory_space<vmem>>, vector<1x128xf32>
    %111 = vector.broadcast %110 : vector<1x128xf32> to vector<24x128xf32>
    %112 = arith.addf %109, %111 : vector<24x128xf32>
    %c2_123 = arith.constant 2 : index
    %c0_124 = arith.constant 0 : index
    %113 = vector.load %arg6[%c2_123, %c0_124] : memref<28x128xf32, #tpu.memory_space<vmem>>, vector<24x128xf32>
    tpu.vector_store %arg6[%c2_123, %c0_124], %112 {strides = array<i32>} : memref<28x128xf32, #tpu.memory_space<vmem>>, vector<24x128xf32>,
    %c2_125 = arith.constant 2 : index
    %c0_126 = arith.constant 0 : index
    %114 = vector.load %arg6[%c2_125, %c0_126] : memref<28x128xf32, #tpu.memory_space<vmem>>, vector<24x128xf32>
    %c0_127 = arith.constant 0 : index
    %c0_128 = arith.constant 0 : index
    %c0_129 = arith.constant 0 : index
    %115 = vector.load %arg4[%c0_127, %c0_128, %c0_129] : memref<1x24x128xf32, #tpu.memory_space<vmem>>, vector<1x24x128xf32>
    %116 = vector.shape_cast %115 : vector<1x24x128xf32> to vector<24x128xf32>
    %117 = vector.shape_cast %114 : vector<24x128xf32> to vector<1x24x128xf32>
    tpu.vector_store %arg4[%c0_127, %c0_128, %c0_129], %117 {strides = array<i32>} : memref<1x24x128xf32, #tpu.memory_space<vmem>>, vector<1x24x128xf32>,
    return
  }
  func.func @transform_0(%arg0: i32) -> (i32, i32, i32) {
    %c0_i32 = arith.constant 0 : i32
    %c0_i32_0 = arith.constant 0 : i32
    %c0_i32_1 = arith.constant 0 : i32
    return %arg0, %c0_i32, %c0_i32_0 : i32, i32, i32
  }
  func.func @transform_1(%arg0: i32) -> (i32, i32, i32, i32) {
    %c0_i32 = arith.constant 0 : i32
    %c0_i32_0 = arith.constant 0 : i32
    %c0_i32_1 = arith.constant 0 : i32
    %c0_i32_2 = arith.constant 0 : i32
    %c0_i32_3 = arith.constant 0 : i32
    return %c0_i32, %c0_i32_0, %c0_i32_1, %c0_i32_2 : i32, i32, i32, i32
  }
  func.func @transform_2(%arg0: i32) -> (i32, i32) {
    %c0_i32 = arith.constant 0 : i32
    %c0_i32_0 = arith.constant 0 : i32
    %c0_i32_1 = arith.constant 0 : i32
    return %c0_i32, %c0_i32_0 : i32, i32
  }
  func.func @transform_3(%arg0: i32) -> (i32, i32, i32) {
    %c0_i32 = arith.constant 0 : i32
    %c0_i32_0 = arith.constant 0 : i32
    %c0_i32_1 = arith.constant 0 : i32
    return %arg0, %c0_i32, %c0_i32_0 : i32, i32, i32
  }
}

</mosaic_0001>

<bundles_post_ra>
// kernel: tpu_custom_call.1
= control target key start
LH: loop header
LB: loop body
LE: loop exit
PB: predicated region body
PF: predicated region fallthrough
CT: control target
= control target key end

     0   :  { %8 = vsyncpa [#allocation5], 0  ;;  %s3180_s0 = inlined_call_operand.vmem [shape: f32[2,24,16], index: 0, kind: input, shape index: {}]   ;;  %s3181_s1 = inlined_call_operand.hbm [shape: bf16[3,5,128,128], index: 1, kind: input, shape index: {}]   ;;  %s3182_s2 = inlined_call_operand.vmem [shape: f32[3,128], index: 2, kind: input, shape index: {}]   ;;  %s3183_s3 = inlined_call_operand.hbm [shape: f32[2,24,128], index: 3, kind: output, shape index: {}]  }
   0x1   :  { %9 = vsyncpa [#allocation6], 0 }
   0x2   :  { %11 = vsyncpa [#allocation6 + $0x1], 0  ;;  %s3021_s12 = smov 0   ;;  %s3023_s13 = smov 0  }
   0x3   :  { %s3025_s14 = smov 0   ;;  %s3027_s15 = smov 0  }
   0x4 LB: > { %s3042_s16 = sadd.s32 4294967295, %s2992_s15   ;;  %s2129_s17 = sadd.s32 4294967294, %s2992_s15   ;;  %s2992_s15 = sphi %s3027_s15, %s3191_s15   ;;  %s2988_s14 = sphi %s3025_s14, %s3190_s14   ;;  %s2984_s13 = sphi %s3023_s13, %s3189_s13   ;;  %s2980_s12 = sphi %s3021_s12, %s3188_s12  }
   0x5   : > { %s3046_s18 = sadd.s32 1, %s2992_s15   ;;  %s92_s19 = sadd.s32 1, %s2988_s14 }
   0x6   : > { %s89_s20 = ssub.s32 %s2992_s15, %s3046_s18  ;;  %p102_p0 = scmp.ne.s32.totalorder %s2988_s14, %s2984_s13 }
   0x7   : > { %p90_p1 = scmp.eq.s32.totalorder %s89_s20, 0  ;;  %p103_p2 = scmp.eq.s32.totalorder %s3042_s16, 1 }
   0x8   : > { %p108_p3 = scmp.ne.s32.totalorder %s2984_s13, %s2980_s12  ;;  %p109_p4 = scmp.eq.s32.totalorder %s2129_s17, 1 }
   0x9   : > { %s3057_s21 = scalar_select %p90_p1, %s2988_s14, %s92_s19  }
   0xa   : > { %p3059_p5 = por %p103_p2, %p102_p0  ;;  %p3063_p6 = por %p109_p4, %p108_p3 }
   0xb   : > { %p2130_p7 = scmp.ge.s32.totalorder %s2992_s15, 1  ;;  %p116_p8 = scmp.lt.s32.totalorder %s2992_s15, 3 }
   0xc   : > { %s3185_s23 = scalar_select %p3063_p6, 1, 0 }
   0xd   : > { %p2729_p9 = scmp.eq.s32.totalorder %s3042_s16, 0  ;;  %p3070_p10 = pnand %p2130_p7, %p116_p8 }
   0xe   : > { %s2994_s25 = smov [#allocation4]  }
   0xf   : > { %s128_s26 = sshll.u32 %s2994_s25, 4  ;;  %p2721_p11 = pneg %p3070_p10  ;;  %s129_s26 = int_to_ptr.vmem [resolvable:$true] %s128_s26 }
  0x10   : > { %s2913_s27 = scalar_lea.vmem %s129_s26, 15360  ;;  %p2921_p3 = scmp.lt.s32.totalorder %s129_s26, %s129_s26 }
  0x11   : > { %p2722_p12 = pnand %p2729_p9, %p2721_p11  ;;  %p2914_p0 = scmp.ne.s32.totalorder %s129_s26, %s2913_s27 }
  0x12   : > { %p2922_p4 = scmp.lt.s32.totalorder %s2913_s27, %s2913_s27 }
  0x13   : > { %p2904_p13 = pneg %p2722_p12 }
  0x14   : > { %p2923_p6 = por %p2922_p4, %p2921_p3 }
  0x15   : > { %p2916_p1 = pnand %p2914_p0, %p2904_p13 }
  0x17   : > { %p2917_p2 = pneg %p2916_p1 }
  0x19   : > { %p2924_p7 = pnand %p2923_p6, %p2917_p2 }
  0x1b   : > { %2927 = shalt.err (!%p2924_p7)
}
  0x1c   : > { %s2995_s28 = smov 64   ;;  %s2996_s29 = smov 4  }
  0x1d   : > { %2724 = dma.hbm_to_vmem [thread:$0]  (!%p2722_p12), %s3181_s1, 15360, %s129_s26, [#allocation5], %s2995_s28, %s2995_s28, %s2996_s29  }
  0x1e   : > { %155 = sbr.rel (%p3070_p10) target bundleno = 934 (0x3a6), region = 32 }
  0x23   : > { %2971 = dma.done.wait (%p2729_p9), [#allocation5], 15360  }
  0x24   : > { %2973 = vsyncadd (%p2729_p9), [#allocation5], 4294951936  ;;  %v2997_v0 = vmov 0.0   ;;  %v2770_v1 = vld [vmem:[#allocation4 + $0x78] sm:$0xff]   ;;  %p179_p6 = scmp.lt.s32.totalorder %s3042_s16, 1  ;;  %v2772_v3 = vld [vmem:[#allocation4 + $0x70] sm:$0xff]  }
  0x25   : > { %185 = vst [vmem:[#allocation2] sm:$0xff] %v2997_v0  ;;  %186 = vst [vmem:[#allocation2 + $0x8] sm:$0xff] %v2997_v0  ;;  %v2771_v2 = vld [vmem:[#allocation4 + $0x38] sm:$0xff]   ;;  %2412 = vmatprep.subr.bf16.mxu0 %v2770_v1  ;;  %v2773_v4 = vld [vmem:[#allocation4 + $0x30] sm:$0xff]   ;;  %vm196_vm0 = vcmask 130048   ;;  %s176_s20 = sand.u32 1, %s2984_s13  }
  0x26   : > { %187 = vst [vmem:[#allocation2 + $0x10] sm:$0xff] %v2997_v0  ;;  %188 = vst [vmem:[#allocation2 + $0x18] sm:$0xf] %v2997_v0  ;;  %2432 = vmatprep.subr.bf16.mxu1 %v2771_v2  ;;  %2413 = vmatpush3.bf16.msra.mxu0 %v2770_v1  ;;  %v2774_v5 = vld [vmem:[#allocation4 + $0x68] sm:$0xff]   ;;  %s180_s5 = scalar_select %p179_p6, %s3042_s16, 1  ;;  %v2776_v7 = vld [vmem:[#allocation4 + $0x60] sm:$0xff]  }
  0x27   : > { %189 = vst [vmem:[#allocation3] sm:$0xff] %v2997_v0  ;;  %190 = vst [vmem:[#allocation3 + $0x8] sm:$0xff] %v2997_v0  ;;  %2433 = vmatpush3.bf16.msra.mxu1 %v2771_v2  ;;  %2414 = vmatprep.subr.bf16.mxu0 %v2772_v3  ;;  %v2775_v6 = vld [vmem:[#allocation4 + $0x28] sm:$0xff]   ;;  %v2777_v8 = vld [vmem:[#allocation4 + $0x20] sm:$0xff]   ;;  %s2712_s24 = smul.u32 24, %s176_s20  ;;  %s2998_s7 = smov [#allocation7]  }
  0x28   : > { %191 = vst [vmem:[#allocation3 + $0x10] sm:$0xff] %v2997_v0  ;;  %192 = vst [vmem:[#allocation3 + $0x18] sm:$0xf] %v2997_v0  ;;  %2434 = vmatprep.subr.bf16.mxu1 %v2773_v4  ;;  %s2713_s6 = smul.u32 24, %s180_s5  ;;  %v2778_v9 = vld [vmem:[#allocation4 + $0x58] sm:$0xff]   ;;  %v2780_v11 = vld [vmem:[#allocation4 + $0x50] sm:$0xff]  }
  0x29   : > { %v2779_v10 = vld [vmem:[#allocation4 + $0x18] sm:$0xff]   ;;  %v2781_v15 = vld [vmem:[#allocation4 + $0x10] sm:$0xff]   ;;  %v2782_v16 = vld [vmem:[#allocation4 + $0x48] sm:$0xff]   ;;  %s2714_s27 = smul.u32 384, %s3042_s16  ;;  %s178_s28 = scalar_lea.vmem [#allocation7], %s2712_s24 }
  0x2a   : > { %2415 = vmatpush3.bf16.msra.mxu0 %v2772_v3  ;;  %s183_s9 = scalar_lea.vmem %s3180_s0, %s2713_s6  ;;  %v2783_v17 = vld [vmem:[#allocation4 + $0x8] sm:$0xff]   ;;  %v2784_v18 = vld [vmem:[#allocation4 + $0x40] sm:$0xff]   ;;  %v2786_v26 = vld [vmem:[#allocation4 + $0xb8] sm:$0xff]   ;;  %s2055_s29 = sshll.u32 %s178_s28, 4  ;;  %s3136_s29 = int_to_ptr.vmem [resolvable:$true] %s2055_s29 }
  0x2b   : > { %2435 = vmatpush3.bf16.msra.mxu1 %v2773_v4  ;;  %2416 = vmatprep.subr.bf16.mxu0 %v2774_v5  ;;  %v193_v12 = vld [vmem:[%s183_s9] sm:$0xff]  ;;  %v194_v13 = vld [vmem:[%s183_s9 + $0x8] sm:$0xff]  ;;  %v195_v14 = vld [vmem:[%s183_s9 + $0x10] sm:$0xff]  ;;  %s3134_s5 = scalar_lea.hbm %s3183_s3, %s2714_s27  ;;  %s3140_s16 = scalar_lea.sflag [#allocation6], %s176_s20 }
  0x2c   : > { %2436 = vmatprep.subr.bf16.mxu1 %v2775_v6  ;;  %197 = vst.msk [vmem:[#allocation2 + $0x2] sm:$0xff] %vm196_vm0, %v193_v12  ;;  %198 = vst.msk [vmem:[#allocation2 + $0xa] sm:$0xff] %vm196_vm0, %v194_v13  ;;  %v2785_v22 = vld [vmem:[#allocation4] sm:$0xff]   ;;  %v2787_v29 = vld [vmem:[#allocation4 + $0xf8] sm:$0xff]   ;;  %s2928_s6 = scalar_lea.vmem %s3136_s29, 384  ;;  %s2932_s8 = sshll.u32 %s2998_s7, 4  ;;  %s2933_s8 = int_to_ptr.vmem [resolvable:$false] %s2932_s8 }
  0x2d   : > { %199 = vst.msk [vmem:[#allocation2 + $0x12] sm:$0xff] %vm196_vm0, %v195_v14  ;;  %v2788_v32 = vld [vmem:[#allocation4 + $0xb0] sm:$0xff]   ;;  %v2790_v36 = vld [vmem:[#allocation4 + $0xa8] sm:$0xff]   ;;  %v2792_v42 = vld [vmem:[#allocation4 + $0xa0] sm:$0xff]   ;;  %p2929_p8 = scmp.ne.s32.totalorder %s3136_s29, %s2928_s6  ;;  %s2934_s9 = scalar_lea.vmem %s2933_s8, 768 }
  0x2e   : > { %2417 = vmatpush3.bf16.msra.mxu0 %v2774_v5  ;;  %v2789_v33 = vld [vmem:[#allocation4 + $0xf0] sm:$0xff]   ;;  %v2791_v38 = vld [vmem:[#allocation4 + $0xe8] sm:$0xff]   ;;  %v2793_v43 = vld [vmem:[#allocation4 + $0xe0] sm:$0xff]   ;;  %p2935_p11 = scmp.lt.s32.totalorder %s3136_s29, %s2933_s8  ;;  %p2936_p12 = scmp.lt.s32.totalorder %s2934_s9, %s2928_s6 }
  0x2f   : > { %2437 = vmatpush3.bf16.msra.mxu1 %v2775_v6  ;;  %2418 = vmatprep.subr.bf16.mxu0 %v2776_v7  ;;  %v2794_v44 = vld [vmem:[#allocation4 + $0x98] sm:$0xff]   ;;  %v2796_v46 = vld [vmem:[#allocation4 + $0x90] sm:$0xff]   ;;  %v2798_v48 = vld [vmem:[#allocation4 + $0x88] sm:$0xff]   ;;  %p2930_p9 = pnand %p2929_p8, %p3059_p5 }
  0x30   : > { %2438 = vmatprep.subr.bf16.mxu1 %v2777_v8  ;;  %v2795_v45 = vld [vmem:[#allocation4 + $0xd8] sm:$0xff]   ;;  %v2797_v47 = vld [vmem:[#allocation4 + $0xd0] sm:$0xff]   ;;  %v2799_v49 = vld [vmem:[#allocation4 + $0xc8] sm:$0xff]   ;;  %p2937_p13 = por %p2936_p12, %p2935_p11 }
  0x31   : > { %v2800_v50 = vld [vmem:[#allocation4 + $0x80] sm:$0xff]   ;;  %v2802_v53 = vld [vmem:[#allocation4 + $0x138] sm:$0xff]   ;;  %v2803_v58 = vld [vmem:[#allocation4 + $0x130] sm:$0xff]   ;;  %p2931_p10 = pneg %p2930_p9 }
  0x32   : > { %2419 = vmatpush3.bf16.msra.mxu0 %v2776_v7  ;;  %v2801_v51 = vld [vmem:[#allocation4 + $0xc0] sm:$0xff]   ;;  %v2804_v61 = vld [vmem:[#allocation4 + $0x128] sm:$0xff]   ;;  %v2806_v63 = vld [vmem:[#allocation4 + $0x118] sm:$0xff]  }
  0x33   : > { %2439 = vmatpush3.bf16.msra.mxu1 %v2777_v8  ;;  %2420 = vmatprep.subr.bf16.mxu0 %v2778_v9  ;;  %v221_v19 = vld [vmem:[#allocation2 + $0x1] sm:$0xff]  ;;  %v222_v20 = vld [vmem:[#allocation2 + $0x9] sm:$0xff]  ;;  %v2810_v5 = vld [vmem:[#allocation4 + $0x1b8] sm:$0xff]   ;;  %p2938_p0 = pnand %p2937_p13, %p2931_p10 }
  0x34   : > { %2440 = vmatprep.subr.bf16.mxu1 %v2779_v10  ;;  %v200_v21 = vld [vmem:[#allocation2] sm:$0xff]  ;;  %v224_v23 = vpack.c.bf16 %v222_v20, %v221_v19  ;;  %v201_v24 = vld [vmem:[#allocation2 + $0x8] sm:$0xff]  ;;  %v223_v27 = vld [vmem:[#allocation2 + $0x11] sm:$0xff] }
  0x35   : > { %v203_v25 = vpack.c.bf16 %v201_v24, %v200_v21  ;;  %v202_v28 = vld [vmem:[#allocation2 + $0x10] sm:$0xff]  ;;  %v225_v30 = vpack.c.bf16 %v223_v27, %v223_v27  ;;  %v435_v34 = vld [vmem:[#allocation2 + $0x2] sm:$0xff]  ;;  %v2811_v6 = vld [vmem:[#allocation4 + $0x178] sm:$0xff]  }
  0x36   : > { %2421 = vmatpush3.bf16.msra.mxu0 %v2778_v9  ;;  %2428 = vmatprep.mubr.bf16.mxu0 %v224_v23  ;;  %v204_v31 = vpack.c.bf16 %v202_v28, %v202_v28  ;;  %v436_v35 = vld [vmem:[#allocation2 + $0xa] sm:$0xff]  ;;  %v437_v52 = vld [vmem:[#allocation2 + $0x12] sm:$0xff]  ;;  %v2805_v62 = vld [vmem:[#allocation4 + $0x120] sm:$0xff]  }
  0x37   : > { %2441 = vmatpush3.bf16.msra.mxu1 %v2779_v10  ;;  %2422 = vmatprep.subr.bf16.mxu0 %v2780_v11  ;;  %v438_v37 = vpack.c.bf16 %v436_v35, %v435_v34  ;;  %v556_v39 = vld [vmem:[#allocation2 + $0x3] sm:$0xff]  ;;  %v557_v40 = vld [vmem:[#allocation2 + $0xb] sm:$0xff]  ;;  %v558_v54 = vld [vmem:[#allocation2 + $0x13] sm:$0xff]  ;;  %v439_v57 = vpack.c.bf16 %v437_v52, %v437_v52 }
  0x38   : > { %2442 = vmatprep.subr.bf16.mxu1 %v2781_v15  ;;  %2448 = vmatprep.mubr.bf16.mxu1 %v203_v25  ;;  %v559_v41 = vpack.c.bf16 %v557_v40, %v556_v39  ;;  %v677_v55 = vld [vmem:[#allocation2 + $0x4] sm:$0xff]  ;;  %v678_v56 = vld [vmem:[#allocation2 + $0xc] sm:$0xff]  ;;  %v560_v59 = vpack.c.bf16 %v558_v54, %v558_v54  ;;  %v679_v3 = vld [vmem:[#allocation2 + $0x14] sm:$0xff] }
  0x39   : > { %v680_v60 = vpack.c.bf16 %v678_v56, %v677_v55  ;;  %v2807_v0 = vld [vmem:[#allocation4 + $0x110] sm:$0xff]   ;;  %v2808_v1 = vld [vmem:[#allocation4 + $0x108] sm:$0xff]   ;;  %v2809_v2 = vld [vmem:[#allocation4 + $0x100] sm:$0xff]   ;;  %v681_v4 = vpack.c.bf16 %v679_v3, %v679_v3 }
  0x3a   : > { %2423 = vmatpush3.bf16.msra.mxu0 %v2780_v11  ;;  %v2812_v7 = vld [vmem:[#allocation4 + $0x1b0] sm:$0xff]   ;;  %v2814_v9 = vld [vmem:[#allocation4 + $0x1a8] sm:$0xff]   ;;  %v2816_v11 = vld [vmem:[#allocation4 + $0x1a0] sm:$0xff]  }
  0x3b   : > { %2443 = vmatpush3.bf16.msra.mxu1 %v2781_v15  ;;  %2424 = vmatprep.subr.bf16.mxu0 %v2782_v16  ;;  %v2813_v8 = vld [vmem:[#allocation4 + $0x170] sm:$0xff]   ;;  %v2815_v10 = vld [vmem:[#allocation4 + $0x168] sm:$0xff]   ;;  %v2817_v12 = vld [vmem:[#allocation4 + $0x160] sm:$0xff]  }
  0x3c   : > { %2444 = vmatprep.subr.bf16.mxu1 %v2783_v17  ;;  %v2818_v13 = vld [vmem:[#allocation4 + $0x198] sm:$0xff]   ;;  %v2820_v15 = vld [vmem:[#allocation4 + $0x190] sm:$0xff]   ;;  %v2824_v19 = vld [vmem:[#allocation4 + $0x180] sm:$0xff]  }
  0x3d   : > { %v2819_v14 = vld [vmem:[#allocation4 + $0x158] sm:$0xff]   ;;  %v2825_v20 = vld [vmem:[#allocation4 + $0x140] sm:$0xff]  }
  0x3e   : > { %2425 = vmatpush3.bf16.msra.mxu0 %v2782_v16  ;;  %v2821_v16 = vld [vmem:[#allocation4 + $0x150] sm:$0xff]   ;;  %v3092_v21 = vld [vmem:[#allocation4 + $0x1f8] sm:$0xff]  }
  0x3f   : > { %2445 = vmatpush3.bf16.msra.mxu1 %v2783_v17  ;;  %2426 = vmatprep.subr.bf16.mxu0 %v2784_v18  ;;  %v2822_v17 = vld [vmem:[#allocation4 + $0x188] sm:$0xff]  }
  0x40   : > { %2446 = vmatprep.subr.bf16.mxu1 %v2785_v22 }
  0x42   : > { %2427 = vmatpush3.bf16.msra.mxu0 %v2784_v18  ;;  %v2823_v18 = vld [vmem:[#allocation4 + $0x148] sm:$0xff]  }
  0x43   : > { %2447 = vmatpush3.bf16.msra.mxu1 %v2785_v22  ;;  %2452 = vmatprep.subr.bf16.mxu0 %v2786_v26  ;;  %v3094_v22 = vld [vmem:[#allocation4 + $0x238] sm:$0xff]  }
  0x44   : > { %2472 = vmatprep.subr.bf16.mxu1 %v2787_v29 }
  0x45   : > { %2429 = vmatmul.mubr.bf16.vlgmr.msra.gmra.mxu0 %v225_v30 }
  0x46   : > { %2449 = vmatmul.mubr.bf16.vlgmr.msra.gmra.mxu1 %v204_v31  ;;  %2453 = vmatpush3.bf16.msra.mxu0 %v2786_v26 }
  0x47   : > { %2473 = vmatpush3.bf16.msra.mxu1 %v2787_v29  ;;  %2454 = vmatprep.subr.bf16.mxu0 %v2788_v32 }
  0x48   : > { %2474 = vmatprep.subr.bf16.mxu1 %v2789_v33  ;;  %2468 = vmatprep.mubr.bf16.mxu0 %v438_v37 }
  0x49   : > { %2488 = vmatprep.mubr.bf16.mxu1 %v559_v41 }
  0x4a   : > { %2455 = vmatpush3.bf16.msra.mxu0 %v2788_v32 }
  0x4b   : > { %2475 = vmatpush3.bf16.msra.mxu1 %v2789_v33  ;;  %2456 = vmatprep.subr.bf16.mxu0 %v2790_v36 }
  0x4c   : > { %2476 = vmatprep.subr.bf16.mxu1 %v2791_v38 }
  0x4e   : > { %2457 = vmatpush3.bf16.msra.mxu0 %v2790_v36 }
  0x4f   : > { %2477 = vmatpush3.bf16.msra.mxu1 %v2791_v38  ;;  %2458 = vmatprep.subr.bf16.mxu0 %v2792_v42 }
  0x50   : > { %2478 = vmatprep.subr.bf16.mxu1 %v2793_v43 }
  0x52   : > { %2459 = vmatpush3.bf16.msra.mxu0 %v2792_v42 }
  0x53   : > { %2479 = vmatpush3.bf16.msra.mxu1 %v2793_v43  ;;  %2460 = vmatprep.subr.bf16.mxu0 %v2794_v44 }
  0x54   : > { %2480 = vmatprep.subr.bf16.mxu1 %v2795_v45 }
  0x56   : > { %2461 = vmatpush3.bf16.msra.mxu0 %v2794_v44 }
  0x57   : > { %2481 = vmatpush3.bf16.msra.mxu1 %v2795_v45  ;;  %2462 = vmatprep.subr.bf16.mxu0 %v2796_v46  ;;  %v2176_v45 = vld [vmem:[%s3182_s2] ss:$0 sm:$0xff] }
  0x58   : > { %2482 = vmatprep.subr.bf16.mxu1 %v2797_v47 }
  0x5a   : > { %2463 = vmatpush3.bf16.msra.mxu0 %v2796_v46 }
  0x5b   : > { %2483 = vmatpush3.bf16.msra.mxu1 %v2797_v47  ;;  %2464 = vmatprep.subr.bf16.mxu0 %v2798_v48 }
  0x5c   : > { %2484 = vmatprep.subr.bf16.mxu1 %v2799_v49 }
  0x5e   : > { %2465 = vmatpush3.bf16.msra.mxu0 %v2798_v48 }
  0x5f   : > { %2485 = vmatpush3.bf16.msra.mxu1 %v2799_v49  ;;  %2466 = vmatprep.subr.bf16.mxu0 %v2800_v50 }
  0x60   : > { %2486 = vmatprep.subr.bf16.mxu1 %v2801_v51 }
  0x62   : > { %2467 = vmatpush3.bf16.msra.mxu0 %v2800_v50 }
  0x63   : > { %2487 = vmatpush3.bf16.msra.mxu1 %v2801_v51  ;;  %2492 = vmatprep.subr.bf16.mxu0 %v2802_v53 }
  0x64   : > { %2512 = vmatprep.subr.bf16.mxu1 %v2810_v5 }
  0x65   : > { %2469 = vmatmul.mubr.bf16.vlgmr.msra.gmra.mxu0 %v439_v57 }
  0x66   : > { %2493 = vmatpush3.bf16.msra.mxu0 %v2802_v53  ;;  %2489 = vmatmul.mubr.bf16.vlgmr.msra.gmra.mxu1 %v560_v59 }
  0x67   : > { %2494 = vmatprep.subr.bf16.mxu0 %v2803_v58  ;;  %2508 = vmatprep.mubr.bf16.mxu0 %v680_v60 }
  0x68   : > { %2513 = vmatpush3.bf16.msra.mxu1 %v2810_v5 }
  0x69   : > { %2514 = vmatprep.subr.bf16.mxu1 %v2812_v7 }
  0x6a   : > { %2495 = vmatpush3.bf16.msra.mxu0 %v2803_v58 }
  0x6b   : > { %2496 = vmatprep.subr.bf16.mxu0 %v2804_v61 }
  0x6c   : > { %2515 = vmatpush3.bf16.msra.mxu1 %v2812_v7 }
  0x6d   : > { %2516 = vmatprep.subr.bf16.mxu1 %v2814_v9 }
  0x6e   : > { %2497 = vmatpush3.bf16.msra.mxu0 %v2804_v61 }
  0x6f   : > { %2498 = vmatprep.subr.bf16.mxu0 %v2805_v62 }
  0x70   : > { %2517 = vmatpush3.bf16.msra.mxu1 %v2814_v9 }
  0x71   : > { %2518 = vmatprep.subr.bf16.mxu1 %v2816_v11 }
  0x72   : > { %2499 = vmatpush3.bf16.msra.mxu0 %v2805_v62 }
  0x73   : > { %2500 = vmatprep.subr.bf16.mxu0 %v2806_v63 }
  0x74   : > { %2519 = vmatpush3.bf16.msra.mxu1 %v2816_v11  ;;  %v2829_v11 = vld [vmem:[#allocation4 + $0x230] sm:$0xff]  }
  0x75   : > { %2520 = vmatprep.subr.bf16.mxu1 %v2818_v13 }
  0x76   : > { %2501 = vmatpush3.bf16.msra.mxu0 %v2806_v63 }
  0x77   : > { %2502 = vmatprep.subr.bf16.mxu0 %v2807_v0 }
  0x78   : > { %2521 = vmatpush3.bf16.msra.mxu1 %v2818_v13 }
  0x79   : > { %2522 = vmatprep.subr.bf16.mxu1 %v2820_v15 }
  0x7a   : > { %2503 = vmatpush3.bf16.msra.mxu0 %v2807_v0 }
  0x7b   : > { %2504 = vmatprep.subr.bf16.mxu0 %v2808_v1 }
  0x7c   : > { %2523 = vmatpush3.bf16.msra.mxu1 %v2820_v15  ;;  %v2831_v15 = vld [vmem:[#allocation4 + $0x228] sm:$0xff]  }
  0x7d   : > { %2524 = vmatprep.subr.bf16.mxu1 %v2822_v17 }
  0x7e   : > { %2505 = vmatpush3.bf16.msra.mxu0 %v2808_v1 }
  0x7f   : > { %2506 = vmatprep.subr.bf16.mxu0 %v2809_v2 }
  0x80   : > { %2525 = vmatpush3.bf16.msra.mxu1 %v2822_v17  ;;  %v2833_v17 = vld [vmem:[#allocation4 + $0x220] sm:$0xff]  }
  0x81   : > { %2526 = vmatprep.subr.bf16.mxu1 %v2824_v19 }
  0x82   : > { %2507 = vmatpush3.bf16.msra.mxu0 %v2809_v2 }
  0x83   : > { %2532 = vmatprep.subr.bf16.mxu0 %v2811_v6 }
  0x84   : > { %2527 = vmatpush3.bf16.msra.mxu1 %v2824_v19  ;;  %v2835_v19 = vld [vmem:[#allocation4 + $0x218] sm:$0xff]  }
  0x85   : > { %2509 = vmatmul.mubr.bf16.vlgmr.msra.gmra.mxu0 %v681_v4  ;;  %2552 = vmatprep.subr.bf16.mxu1 %v3092_v21 }
  0x86   : > { %2533 = vmatpush3.bf16.msra.mxu0 %v2811_v6 }
  0x87   : > { %2534 = vmatprep.subr.bf16.mxu0 %v2813_v8 }
  0x8a   : > { %2535 = vmatpush3.bf16.msra.mxu0 %v2813_v8 }
  0x8b   : > { %2536 = vmatprep.subr.bf16.mxu0 %v2815_v10 }
  0x8e   : > { %2537 = vmatpush3.bf16.msra.mxu0 %v2815_v10  ;;  %v2828_v10 = vld [vmem:[#allocation4 + $0x1f0] sm:$0xff]  }
  0x8f   : > { %2538 = vmatprep.subr.bf16.mxu0 %v2817_v12 }
  0x92   : > { %2539 = vmatpush3.bf16.msra.mxu0 %v2817_v12 }
  0x93   : > { %2540 = vmatprep.subr.bf16.mxu0 %v2819_v14 }
  0x96   : > { %2541 = vmatpush3.bf16.msra.mxu0 %v2819_v14  ;;  %v2830_v14 = vld [vmem:[#allocation4 + $0x1e8] sm:$0xff]  }
  0x97   : > { %2542 = vmatprep.subr.bf16.mxu0 %v2821_v16 }
  0x9a   : > { %2543 = vmatpush3.bf16.msra.mxu0 %v2821_v16  ;;  %v2832_v16 = vld [vmem:[#allocation4 + $0x1e0] sm:$0xff]  }
  0x9b   : > { %2544 = vmatprep.subr.bf16.mxu0 %v2823_v18 }
  0x9e   : > { %2545 = vmatpush3.bf16.msra.mxu0 %v2823_v18  ;;  %v2834_v18 = vld [vmem:[#allocation4 + $0x1d8] sm:$0xff]  }
  0x9f   : > { %2546 = vmatprep.subr.bf16.mxu0 %v2825_v20 }
  0xa2   : > { %2547 = vmatpush3.bf16.msra.mxu0 %v2825_v20  ;;  %v2836_v20 = vld [vmem:[#allocation4 + $0x1d0] sm:$0xff]  }
  0xa3   : > { %2572 = vmatprep.subr.bf16.mxu0 %v3094_v22 }
 0x105   : > { %v2430_v23 = vpop.f32.mrf.mxu0 }
 0x106   : > { %v2450_v24 = vpop.f32.mrf.mxu1 }
 0x107   : > { %v325_v25 = vpop.f32.mrf.mxu0  ;;  %v430_v37 = vadd.f32 %v2450_v24, %v2430_v23  ;;  %v2839_v23 = vld [vmem:[#allocation4 + $0x208] sm:$0xff]   ;;  %v2840_v24 = vld [vmem:[#allocation4 + $0x1c0] sm:$0xff]  }
 0x108   : > { %v421_v26 = vpop.f32.mrf.mxu1 }
 0x109   : > { %v2431_v27 = vpop.f32.mrf.mxu0  ;;  %v422_v38 = vadd.f32 %v421_v26, %v325_v25  ;;  %v2841_v25 = vld [vmem:[#allocation4 + $0x200] sm:$0xff]   ;;  %v2842_v26 = vld [vmem:[#allocation4 + $0x278] sm:$0xff]  }
 0x10a   : > { %v2451_v28 = vpop.f32.mrf.mxu1 }
 0x10b   : > { %v328_v29 = vpop.f32.mrf.mxu0 }
 0x10c   : > { %v424_v30 = vpop.f32.mrf.mxu1 }
 0x10d   : > { %v425_v42 = vadd.f32 %v424_v30, %v328_v29 }
 0x125   : > { %v2470_v31 = vpop.f32.mrf.mxu0 }
 0x126   : > { %v2490_v32 = vpop.f32.mrf.mxu1  ;;  %v555_v39 = vadd.f32 %v2470_v31, %v430_v37  ;;  %v2847_v37 = vld [vmem:[#allocation4 + $0x250] sm:$0xff]  }
 0x127   : > { %v539_v33 = vpop.f32.mrf.mxu0 }
 0x128   : > { %v660_v34 = vpop.f32.mrf.mxu1  ;;  %v553_v40 = vadd.f32 %v539_v33, %v422_v38  ;;  %v676_v43 = vadd.f32 %v2490_v32, %v555_v39  ;;  %v2843_v32 = vld [vmem:[#allocation4 + $0x270] sm:$0xff]   ;;  %v2848_v38 = vld [vmem:[#allocation4 + $0x248] sm:$0xff]   ;;  %v2849_v39 = vld [vmem:[#allocation4 + $0x240] sm:$0xff]  }
 0x129   : > { %v2471_v35 = vpop.f32.mrf.mxu0 }
 0x12a   : > { %v2491_v36 = vpop.f32.mrf.mxu1  ;;  %v674_v46 = vadd.f32 %v660_v34, %v553_v40  ;;  %v2844_v34 = vld [vmem:[#allocation4 + $0x268] sm:$0xff]   ;;  %v2845_v35 = vld [vmem:[#allocation4 + $0x260] sm:$0xff]  }
 0x12b   : > { %v542_v41 = vpop.f32.mrf.mxu0  ;;  %v2846_v36 = vld [vmem:[#allocation4 + $0x258] sm:$0xff]  }
 0x12c   : > { %v554_v47 = vadd.f32 %v542_v41, %v425_v42  ;;  %v663_v49 = vpop.f32.mrf.mxu1  ;;  %v2850_v42 = vld [vmem:[#allocation4 + $0x2f8] sm:$0xff]  }
 0x12e   : > { %v675_v54 = vadd.f32 %v663_v49, %v554_v47  ;;  %v2855_v47 = vld [vmem:[#allocation4 + $0x2a8] sm:$0xff]   ;;  %v2857_v49 = vld [vmem:[#allocation4 + $0x2a0] sm:$0xff]  }
 0x145   : > { %v2510_v44 = vpop.f32.mrf.mxu0 }
 0x146   : > { %v797_v48 = vadd.f32 %v2510_v44, %v676_v43  ;;  %v2851_v43 = vld [vmem:[#allocation4 + $0x2b8] sm:$0xff]   ;;  %v2852_v44 = vld [vmem:[#allocation4 + $0x2f0] sm:$0xff]  }
 0x147   : > { %v781_v50 = vpop.f32.mrf.mxu0 }
 0x148   : > { %v805_v51 = vadd.f32 %v2176_v45, %v797_v48  ;;  %v795_v52 = vadd.f32 %v781_v50, %v674_v46  ;;  %v2854_v46 = vld [vmem:[#allocation4 + $0x2e8] sm:$0xff]   ;;  %v2856_v48 = vld [vmem:[#allocation4 + $0x2e0] sm:$0xff]   ;;  %v2858_v50 = vld [vmem:[#allocation4 + $0x2d8] sm:$0xff]  }
 0x149   : > { %v2511_v53 = vpop.f32.mrf.mxu0 }
 0x14a   : > { %2890 = vtanh.f32 %v805_v51  ;;  %v803_v55 = vadd.f32 %v2176_v45, %v795_v52  ;;  %v2859_v51 = vld [vmem:[#allocation4 + $0x298] sm:$0xff]   ;;  %v2860_v52 = vld [vmem:[#allocation4 + $0x2d0] sm:$0xff]  }
 0x14b   : > { %v784_v56 = vpop.f32.mrf.mxu0  ;;  %v2861_v53 = vld [vmem:[#allocation4 + $0x290] sm:$0xff]  }
 0x14c   : > { %2892 = vtanh.f32 %v803_v55  ;;  %v796_v57 = vadd.f32 %v784_v56, %v675_v54  ;;  %v2862_v54 = vld [vmem:[#allocation4 + $0x2c8] sm:$0xff]   ;;  %v2864_v56 = vld [vmem:[#allocation4 + $0x2c0] sm:$0xff]  }
 0x14d   : > { %v2863_v55 = vld [vmem:[#allocation4 + $0x288] sm:$0xff]  }
 0x14e   : > { %v804_v58 = vadd.f32 %v2176_v45, %v796_v57  ;;  %v2853_v45 = vld [vmem:[#allocation4 + $0x2b0] sm:$0xff]   ;;  %v2865_v57 = vld [vmem:[#allocation4 + $0x280] sm:$0xff]  }
 0x150   : > { %2894 = vtanh.f32 %v804_v58  ;;  %v3108_v58 = vld [vmem:[#allocation4 + $0x338] sm:$0xff]  }
 0x157   : > { %v3101_v59 = vpop.eup %2890 }
 0x158   : > { %811 = vst [vmem:[#allocation3 + $0x12] sm:$0xff] %v3101_v59  ;;  %v1052_v30 = vpack.c.bf16 %v3101_v59, %v3101_v59  ;;  %v3110_v59 = vld [vmem:[#allocation4 + $0x378] sm:$0xff]  }
 0x159   : > { %v2893_v60 = vpop.eup %2892 }
 0x15a   : > { %809 = vst [vmem:[#allocation3 + $0x2] sm:$0xff] %v2893_v60 }
 0x15d   : > { %v2895_v61 = vpop.eup %2894 }
 0x15e   : > { %810 = vst [vmem:[#allocation3 + $0xa] sm:$0xff] %v2895_v61  ;;  %v1051_v12 = vpack.c.bf16 %v2895_v61, %v2893_v60 }
 0x15f   : > { %v1171_v27 = vld [vmem:[#allocation3 + $0x13] sm:$0xff] }
 0x160   : > { %v1173_v31 = vpack.c.bf16 %v1171_v27, %v1171_v27  ;;  %v1292_v40 = vld [vmem:[#allocation3 + $0x14] sm:$0xff] }
 0x161   : > { %v834_v62 = vld [vmem:[#allocation3 + $0x1] sm:$0xff]  ;;  %v1294_v41 = vpack.c.bf16 %v1292_v40, %v1292_v40 }
 0x162   : > { %v812_v63 = vld [vmem:[#allocation3] sm:$0xff] }
 0x165   : > { %v835_v0 = vld [vmem:[#allocation3 + $0x9] sm:$0xff]  ;;  %v836_v2 = vld [vmem:[#allocation3 + $0x11] sm:$0xff] }
 0x166   : > { %v813_v1 = vld [vmem:[#allocation3 + $0x8] sm:$0xff]  ;;  %v837_v3 = vpack.c.bf16 %v835_v0, %v834_v62  ;;  %v838_v5 = vpack.c.bf16 %v836_v2, %v836_v2  ;;  %v814_v6 = vld [vmem:[#allocation3 + $0x10] sm:$0xff] }
 0x167   : > { %v815_v4 = vpack.c.bf16 %v813_v1, %v812_v63  ;;  %v1169_v7 = vld [vmem:[#allocation3 + $0x3] sm:$0xff]  ;;  %v1170_v8 = vld [vmem:[#allocation3 + $0xb] sm:$0xff]  ;;  %v816_v9 = vpack.c.bf16 %v814_v6, %v814_v6 }
 0x168   : > { %2528 = vmatprep.mubr.bf16.mxu1 %v837_v3  ;;  %v1172_v13 = vpack.c.bf16 %v1170_v8, %v1169_v7  ;;  %v1290_v28 = vld [vmem:[#allocation3 + $0x4] sm:$0xff]  ;;  %v1291_v29 = vld [vmem:[#allocation3 + $0xc] sm:$0xff] }
 0x169   : > { %2548 = vmatprep.mubr.bf16.mxu0 %v815_v4  ;;  %2529 = vmatmul.mubr.bf16.vlgmr.msra.gmra.mxu1 %v838_v5  ;;  %v1293_v33 = vpack.c.bf16 %v1291_v29, %v1290_v28 }
 0x16a   : > { %2549 = vmatmul.mubr.bf16.vlgmr.msra.gmra.mxu0 %v816_v9  ;;  %2553 = vmatpush3.bf16.msra.mxu1 %v3092_v21  ;;  %v2837_v21 = vld [vmem:[#allocation4 + $0x210] sm:$0xff]  }
 0x16b   : > { %2573 = vmatpush3.bf16.msra.mxu0 %v3094_v22  ;;  %2568 = vmatprep.mubr.bf16.mxu1 %v1051_v12  ;;  %v2838_v22 = vld [vmem:[#allocation4 + $0x1c8] sm:$0xff]  }
 0x16c   : > { %2588 = vmatprep.mubr.bf16.mxu0 %v1172_v13  ;;  %2554 = vmatprep.subr.bf16.mxu1 %v2828_v10 }
 0x16d   : > { %2574 = vmatprep.subr.bf16.mxu0 %v2829_v11 }
 0x16e   : > { %2555 = vmatpush3.bf16.msra.mxu1 %v2828_v10 }
 0x16f   : > { %2575 = vmatpush3.bf16.msra.mxu0 %v2829_v11  ;;  %2556 = vmatprep.subr.bf16.mxu1 %v2830_v14 }
 0x170   : > { %2576 = vmatprep.subr.bf16.mxu0 %v2831_v15 }
 0x172   : > { %2557 = vmatpush3.bf16.msra.mxu1 %v2830_v14 }
 0x173   : > { %2577 = vmatpush3.bf16.msra.mxu0 %v2831_v15  ;;  %2558 = vmatprep.subr.bf16.mxu1 %v2832_v16 }
 0x174   : > { %2578 = vmatprep.subr.bf16.mxu0 %v2833_v17 }
 0x176   : > { %2559 = vmatpush3.bf16.msra.mxu1 %v2832_v16 }
 0x177   : > { %2579 = vmatpush3.bf16.msra.mxu0 %v2833_v17  ;;  %2560 = vmatprep.subr.bf16.mxu1 %v2834_v18 }
 0x178   : > { %2580 = vmatprep.subr.bf16.mxu0 %v2835_v19 }
 0x17a   : > { %2561 = vmatpush3.bf16.msra.mxu1 %v2834_v18  ;;  %v2217_v18 = vld [vmem:[%s3182_s2 + $0x1] ss:$0 sm:$0xff] }
 0x17b   : > { %2581 = vmatpush3.bf16.msra.mxu0 %v2835_v19  ;;  %2562 = vmatprep.subr.bf16.mxu1 %v2836_v20 }
 0x17c   : > { %2582 = vmatprep.subr.bf16.mxu0 %v2837_v21 }
 0x17e   : > { %2563 = vmatpush3.bf16.msra.mxu1 %v2836_v20 }
 0x17f   : > { %2583 = vmatpush3.bf16.msra.mxu0 %v2837_v21  ;;  %2564 = vmatprep.subr.bf16.mxu1 %v2838_v22 }
 0x180   : > { %2584 = vmatprep.subr.bf16.mxu0 %v2839_v23 }
 0x182   : > { %2565 = vmatpush3.bf16.msra.mxu1 %v2838_v22 }
 0x183   : > { %2585 = vmatpush3.bf16.msra.mxu0 %v2839_v23  ;;  %2566 = vmatprep.subr.bf16.mxu1 %v2840_v24 }
 0x184   : > { %2586 = vmatprep.subr.bf16.mxu0 %v2841_v25 }
 0x186   : > { %2567 = vmatpush3.bf16.msra.mxu1 %v2840_v24 }
 0x187   : > { %2587 = vmatpush3.bf16.msra.mxu0 %v2841_v25  ;;  %2592 = vmatprep.subr.bf16.mxu1 %v2842_v26 }
 0x188   : > { %2612 = vmatprep.subr.bf16.mxu0 %v2850_v42 }
 0x189   : > { %2569 = vmatmul.mubr.bf16.vlgmr.msra.gmra.mxu1 %v1052_v30 }
 0x18a   : > { %2589 = vmatmul.mubr.bf16.vlgmr.msra.gmra.mxu0 %v1173_v31  ;;  %2593 = vmatpush3.bf16.msra.mxu1 %v2842_v26 }
 0x18b   : > { %2608 = vmatprep.mubr.bf16.mxu1 %v1293_v33  ;;  %2594 = vmatprep.subr.bf16.mxu1 %v2843_v32 }
 0x18c   : > { %2613 = vmatpush3.bf16.msra.mxu0 %v2850_v42 }
 0x18d   : > { %2614 = vmatprep.subr.bf16.mxu0 %v2852_v44 }
 0x18e   : > { %2595 = vmatpush3.bf16.msra.mxu1 %v2843_v32 }
 0x18f   : > { %2596 = vmatprep.subr.bf16.mxu1 %v2844_v34 }
 0x190   : > { %2615 = vmatpush3.bf16.msra.mxu0 %v2852_v44 }
 0x191   : > { %2616 = vmatprep.subr.bf16.mxu0 %v2854_v46 }
 0x192   : > { %2597 = vmatpush3.bf16.msra.mxu1 %v2844_v34 }
 0x193   : > { %2598 = vmatprep.subr.bf16.mxu1 %v2845_v35 }
 0x194   : > { %2617 = vmatpush3.bf16.msra.mxu0 %v2854_v46 }
 0x195   : > { %2618 = vmatprep.subr.bf16.mxu0 %v2856_v48 }
 0x196   : > { %2599 = vmatpush3.bf16.msra.mxu1 %v2845_v35 }
 0x197   : > { %2600 = vmatprep.subr.bf16.mxu1 %v2846_v36 }
 0x198   : > { %2619 = vmatpush3.bf16.msra.mxu0 %v2856_v48  ;;  %v2869_v48 = vld [vmem:[#allocation4 + $0x370] sm:$0xff]  }
 0x199   : > { %2620 = vmatprep.subr.bf16.mxu0 %v2858_v50 }
 0x19a   : > { %2601 = vmatpush3.bf16.msra.mxu1 %v2846_v36 }
 0x19b   : > { %2602 = vmatprep.subr.bf16.mxu1 %v2847_v37 }
 0x19c   : > { %2621 = vmatpush3.bf16.msra.mxu0 %v2858_v50 }
 0x19d   : > { %2622 = vmatprep.subr.bf16.mxu0 %v2860_v52 }
 0x19e   : > { %2603 = vmatpush3.bf16.msra.mxu1 %v2847_v37 }
 0x19f   : > { %2604 = vmatprep.subr.bf16.mxu1 %v2848_v38 }
 0x1a0   : > { %2623 = vmatpush3.bf16.msra.mxu0 %v2860_v52  ;;  %v2871_v52 = vld [vmem:[#allocation4 + $0x368] sm:$0xff]  }
 0x1a1   : > { %2624 = vmatprep.subr.bf16.mxu0 %v2862_v54 }
 0x1a2   : > { %2605 = vmatpush3.bf16.msra.mxu1 %v2848_v38 }
 0x1a3   : > { %2606 = vmatprep.subr.bf16.mxu1 %v2849_v39 }
 0x1a4   : > { %2625 = vmatpush3.bf16.msra.mxu0 %v2862_v54  ;;  %v2873_v54 = vld [vmem:[#allocation4 + $0x360] sm:$0xff]  }
 0x1a5   : > { %2626 = vmatprep.subr.bf16.mxu0 %v2864_v56 }
 0x1a6   : > { %2607 = vmatpush3.bf16.msra.mxu1 %v2849_v39 }
 0x1a7   : > { %2632 = vmatprep.subr.bf16.mxu1 %v2851_v43 }
 0x1a8   : > { %2627 = vmatpush3.bf16.msra.mxu0 %v2864_v56  ;;  %v2875_v56 = vld [vmem:[#allocation4 + $0x358] sm:$0xff]  }
 0x1a9   : > { %2609 = vmatmul.mubr.bf16.vlgmr.msra.gmra.mxu1 %v1294_v41  ;;  %2652 = vmatprep.subr.bf16.mxu0 %v3108_v58 }
 0x1aa   : > { %2633 = vmatpush3.bf16.msra.mxu1 %v2851_v43 }
 0x1ab   : > { %2634 = vmatprep.subr.bf16.mxu1 %v2853_v45 }
 0x1ae   : > { %2635 = vmatpush3.bf16.msra.mxu1 %v2853_v45 }
 0x1af   : > { %2636 = vmatprep.subr.bf16.mxu1 %v2855_v47 }
 0x1b2   : > { %2637 = vmatpush3.bf16.msra.mxu1 %v2855_v47  ;;  %v2868_v47 = vld [vmem:[#allocation4 + $0x330] sm:$0xff]  }
 0x1b3   : > { %2638 = vmatprep.subr.bf16.mxu1 %v2857_v49 }
 0x1b6   : > { %2639 = vmatpush3.bf16.msra.mxu1 %v2857_v49 }
 0x1b7   : > { %2640 = vmatprep.subr.bf16.mxu1 %v2859_v51 }
 0x1ba   : > { %2641 = vmatpush3.bf16.msra.mxu1 %v2859_v51  ;;  %v2870_v51 = vld [vmem:[#allocation4 + $0x328] sm:$0xff]  }
 0x1bb   : > { %2642 = vmatprep.subr.bf16.mxu1 %v2861_v53 }
 0x1be   : > { %2643 = vmatpush3.bf16.msra.mxu1 %v2861_v53  ;;  %v2872_v53 = vld [vmem:[#allocation4 + $0x320] sm:$0xff]  }
 0x1bf   : > { %2644 = vmatprep.subr.bf16.mxu1 %v2863_v55 }
 0x1c2   : > { %2645 = vmatpush3.bf16.msra.mxu1 %v2863_v55  ;;  %v2874_v55 = vld [vmem:[#allocation4 + $0x318] sm:$0xff]  }
 0x1c3   : > { %2646 = vmatprep.subr.bf16.mxu1 %v2865_v57 }
 0x1c6   : > { %2647 = vmatpush3.bf16.msra.mxu1 %v2865_v57  ;;  %v2876_v57 = vld [vmem:[#allocation4 + $0x310] sm:$0xff]  }
 0x1c7   : > { %2672 = vmatprep.subr.bf16.mxu1 %v3110_v59 }
 0x229   : > { %v2530_v60 = vpop.f32.mrf.mxu1 }
 0x22a   : > { %v2550_v61 = vpop.f32.mrf.mxu0 }
 0x22b   : > { %v938_v62 = vpop.f32.mrf.mxu1  ;;  %v1043_v10 = vadd.f32 %v2550_v61, %v2530_v60  ;;  %v2879_v60 = vld [vmem:[#allocation4 + $0x348] sm:$0xff]   ;;  %v2880_v61 = vld [vmem:[#allocation4 + $0x300] sm:$0xff]  }
 0x22c   : > { %v1034_v63 = vpop.f32.mrf.mxu0 }
 0x22d   : > { %v2531_v0 = vpop.f32.mrf.mxu1  ;;  %v1035_v11 = vadd.f32 %v1034_v63, %v938_v62  ;;  %v2881_v62 = vld [vmem:[#allocation4 + $0x340] sm:$0xff]   ;;  %v2882_v63 = vld [vmem:[#allocation4 + $0x3b8] sm:$0xff]  }
 0x22e   : > { %v2551_v1 = vpop.f32.mrf.mxu0 }
 0x22f   : > { %v941_v2 = vpop.f32.mrf.mxu1 }
 0x230   : > { %v1037_v3 = vpop.f32.mrf.mxu0 }
 0x231   : > { %v1038_v15 = vadd.f32 %v1037_v3, %v941_v2 }
 0x249   : > { %v2570_v4 = vpop.f32.mrf.mxu1 }
 0x24a   : > { %v2590_v5 = vpop.f32.mrf.mxu0  ;;  %v1168_v12 = vadd.f32 %v2570_v4, %v1043_v10  ;;  %v2887_v10 = vld [vmem:[#allocation4 + $0x390] sm:$0xff]  }
 0x24b   : > { %v1152_v6 = vpop.f32.mrf.mxu1 }
 0x24c   : > { %v1273_v7 = vpop.f32.mrf.mxu0  ;;  %v1166_v13 = vadd.f32 %v1152_v6, %v1035_v11  ;;  %v1289_v16 = vadd.f32 %v2590_v5, %v1168_v12  ;;  %v2883_v5 = vld [vmem:[#allocation4 + $0x3b0] sm:$0xff]   ;;  %v2888_v11 = vld [vmem:[#allocation4 + $0x388] sm:$0xff]   ;;  %v2889_v12 = vld [vmem:[#allocation4 + $0x380] sm:$0xff]  }
 0x24d   : > { %v2571_v8 = vpop.f32.mrf.mxu1 }
 0x24e   : > { %v2591_v9 = vpop.f32.mrf.mxu0  ;;  %v1287_v19 = vadd.f32 %v1273_v7, %v1166_v13  ;;  %v2884_v7 = vld [vmem:[#allocation4 + $0x3a8] sm:$0xff]   ;;  %v2885_v8 = vld [vmem:[#allocation4 + $0x3a0] sm:$0xff]  }
 0x24f   : > { %v1155_v14 = vpop.f32.mrf.mxu1  ;;  %v2886_v9 = vld [vmem:[#allocation4 + $0x398] sm:$0xff]  }
 0x250   : > { %v1167_v20 = vadd.f32 %v1155_v14, %v1038_v15  ;;  %v1276_v25 = vpop.f32.mrf.mxu0 }
 0x252   : > { %v1288_v27 = vadd.f32 %v1276_v25, %v1167_v20 }
 0x269   : > { %v2610_v17 = vpop.f32.mrf.mxu1 }
 0x26a   : > { %v1410_v21 = vadd.f32 %v2610_v17, %v1289_v16 }
 0x26b   : > { %v1394_v22 = vpop.f32.mrf.mxu1 }
 0x26c   : > { %v1418_v23 = vadd.f32 %v2217_v18, %v1410_v21  ;;  %v1408_v24 = vadd.f32 %v1394_v22, %v1287_v19 }
 0x26d   : > { %v2611_v26 = vpop.f32.mrf.mxu1 }
 0x26e   : > { %2896 = vtanh.f32 %v1418_v23  ;;  %v1416_v28 = vadd.f32 %v2217_v18, %v1408_v24 }
 0x26f   : > { %v1397_v29 = vpop.f32.mrf.mxu1 }
 0x270   : > { %2898 = vtanh.f32 %v1416_v28  ;;  %v1409_v30 = vadd.f32 %v1397_v29, %v1288_v27 }
 0x272   : > { %v1417_v31 = vadd.f32 %v2217_v18, %v1409_v30 }
 0x274   : > { %2900 = vtanh.f32 %v1417_v31 }
 0x27b   : > { %v3117_v32 = vpop.eup %2896 }
 0x27c   : > { %1424 = vst [vmem:[#allocation2 + $0x12] sm:$0xff] %v3117_v32  ;;  %v1665_v3 = vpack.c.bf16 %v3117_v32, %v3117_v32 }
 0x27d   : > { %v2899_v33 = vpop.eup %2898 }
 0x27e   : > { %1422 = vst [vmem:[#allocation2 + $0x2] sm:$0xff] %v2899_v33 }
 0x281   : > { %v2901_v34 = vpop.eup %2900 }
 0x282   : > { %1423 = vst [vmem:[#allocation2 + $0xa] sm:$0xff] %v2901_v34  ;;  %v1664_v49 = vpack.c.bf16 %v2901_v34, %v2899_v33 }
 0x283   : > { %v1784_v0 = vld [vmem:[#allocation2 + $0x13] sm:$0xff] }
 0x284   : > { %v1786_v4 = vpack.c.bf16 %v1784_v0, %v1784_v0  ;;  %v1905_v13 = vld [vmem:[#allocation2 + $0x14] sm:$0xff] }
 0x285   : > { %v1447_v35 = vld [vmem:[#allocation2 + $0x1] sm:$0xff]  ;;  %v1907_v14 = vpack.c.bf16 %v1905_v13, %v1905_v13 }
 0x286   : > { %v1425_v36 = vld [vmem:[#allocation2] sm:$0xff] }
 0x289   : > { %v1448_v37 = vld [vmem:[#allocation2 + $0x9] sm:$0xff]  ;;  %v1449_v39 = vld [vmem:[#allocation2 + $0x11] sm:$0xff] }
 0x28a   : > { %v1426_v38 = vld [vmem:[#allocation2 + $0x8] sm:$0xff]  ;;  %v1450_v40 = vpack.c.bf16 %v1448_v37, %v1447_v35  ;;  %v1451_v42 = vpack.c.bf16 %v1449_v39, %v1449_v39  ;;  %v1427_v43 = vld [vmem:[#allocation2 + $0x10] sm:$0xff]  ;;  %v2258_v37 = vld [vmem:[%s3182_s2 + $0x2] ss:$0 sm:$0xff] }
 0x28b   : > { %v1428_v41 = vpack.c.bf16 %v1426_v38, %v1425_v36  ;;  %v1782_v44 = vld [vmem:[#allocation2 + $0x3] sm:$0xff]  ;;  %v1783_v45 = vld [vmem:[#allocation2 + $0xb] sm:$0xff]  ;;  %v1429_v46 = vpack.c.bf16 %v1427_v43, %v1427_v43 }
 0x28c   : > { %2628 = vmatprep.mubr.bf16.mxu0 %v1450_v40  ;;  %v1785_v50 = vpack.c.bf16 %v1783_v45, %v1782_v44  ;;  %v1903_v1 = vld [vmem:[#allocation2 + $0x4] sm:$0xff]  ;;  %v1904_v2 = vld [vmem:[#allocation2 + $0xc] sm:$0xff] }
 0x28d   : > { %2648 = vmatprep.mubr.bf16.mxu1 %v1428_v41  ;;  %2629 = vmatmul.mubr.bf16.vlgmr.msra.gmra.mxu0 %v1451_v42  ;;  %v1906_v6 = vpack.c.bf16 %v1904_v2, %v1903_v1 }
 0x28e   : > { %2649 = vmatmul.mubr.bf16.vlgmr.msra.gmra.mxu1 %v1429_v46  ;;  %2653 = vmatpush3.bf16.msra.mxu0 %v3108_v58  ;;  %v2877_v58 = vld [vmem:[#allocation4 + $0x350] sm:$0xff]  }
 0x28f   : > { %2673 = vmatpush3.bf16.msra.mxu1 %v3110_v59  ;;  %2668 = vmatprep.mubr.bf16.mxu0 %v1664_v49  ;;  %v2878_v59 = vld [vmem:[#allocation4 + $0x308] sm:$0xff]  }
 0x290   : > { %2688 = vmatprep.mubr.bf16.mxu1 %v1785_v50  ;;  %2654 = vmatprep.subr.bf16.mxu0 %v2868_v47 }
 0x291   : > { %2674 = vmatprep.subr.bf16.mxu1 %v2869_v48 }
 0x292   : > { %2655 = vmatpush3.bf16.msra.mxu0 %v2868_v47 }
 0x293   : > { %2675 = vmatpush3.bf16.msra.mxu1 %v2869_v48  ;;  %2656 = vmatprep.subr.bf16.mxu0 %v2870_v51 }
 0x294   : > { %2676 = vmatprep.subr.bf16.mxu1 %v2871_v52 }
 0x296   : > { %2657 = vmatpush3.bf16.msra.mxu0 %v2870_v51 }
 0x297   : > { %2677 = vmatpush3.bf16.msra.mxu1 %v2871_v52  ;;  %2658 = vmatprep.subr.bf16.mxu0 %v2872_v53 }
 0x298   : > { %2678 = vmatprep.subr.bf16.mxu1 %v2873_v54 }
 0x29a   : > { %2659 = vmatpush3.bf16.msra.mxu0 %v2872_v53 }
 0x29b   : > { %2679 = vmatpush3.bf16.msra.mxu1 %v2873_v54  ;;  %2660 = vmatprep.subr.bf16.mxu0 %v2874_v55 }
 0x29c   : > { %2680 = vmatprep.subr.bf16.mxu1 %v2875_v56 }
 0x29e   : > { %2661 = vmatpush3.bf16.msra.mxu0 %v2874_v55 }
 0x29f   : > { %2681 = vmatpush3.bf16.msra.mxu1 %v2875_v56  ;;  %2662 = vmatprep.subr.bf16.mxu0 %v2876_v57 }
 0x2a0   : > { %2682 = vmatprep.subr.bf16.mxu1 %v2877_v58 }
 0x2a2   : > { %2663 = vmatpush3.bf16.msra.mxu0 %v2876_v57 }
 0x2a3   : > { %2683 = vmatpush3.bf16.msra.mxu1 %v2877_v58  ;;  %2664 = vmatprep.subr.bf16.mxu0 %v2878_v59 }
 0x2a4   : > { %2684 = vmatprep.subr.bf16.mxu1 %v2879_v60 }
 0x2a6   : > { %2665 = vmatpush3.bf16.msra.mxu0 %v2878_v59 }
 0x2a7   : > { %2685 = vmatpush3.bf16.msra.mxu1 %v2879_v60  ;;  %2666 = vmatprep.subr.bf16.mxu0 %v2880_v61 }
 0x2a8   : > { %2686 = vmatprep.subr.bf16.mxu1 %v2881_v62 }
 0x2aa   : > { %2667 = vmatpush3.bf16.msra.mxu0 %v2880_v61 }
 0x2ab   : > { %2687 = vmatpush3.bf16.msra.mxu1 %v2881_v62  ;;  %2692 = vmatprep.subr.bf16.mxu0 %v2882_v63 }
 0x2ad   : > { %2669 = vmatmul.mubr.bf16.vlgmr.msra.gmra.mxu0 %v1665_v3 }
 0x2ae   : > { %2689 = vmatmul.mubr.bf16.vlgmr.msra.gmra.mxu1 %v1786_v4  ;;  %2693 = vmatpush3.bf16.msra.mxu0 %v2882_v63 }
 0x2af   : > { %2708 = vmatprep.mubr.bf16.mxu0 %v1906_v6  ;;  %2694 = vmatprep.subr.bf16.mxu0 %v2883_v5 }
 0x2b2   : > { %2695 = vmatpush3.bf16.msra.mxu0 %v2883_v5 }
 0x2b3   : > { %2696 = vmatprep.subr.bf16.mxu0 %v2884_v7 }
 0x2b6   : > { %2697 = vmatpush3.bf16.msra.mxu0 %v2884_v7 }
 0x2b7   : > { %2698 = vmatprep.subr.bf16.mxu0 %v2885_v8 }
 0x2ba   : > { %2699 = vmatpush3.bf16.msra.mxu0 %v2885_v8 }
 0x2bb   : > { %2700 = vmatprep.subr.bf16.mxu0 %v2886_v9 }
 0x2be   : > { %2701 = vmatpush3.bf16.msra.mxu0 %v2886_v9 }
 0x2bf   : > { %2702 = vmatprep.subr.bf16.mxu0 %v2887_v10 }
 0x2c2   : > { %2703 = vmatpush3.bf16.msra.mxu0 %v2887_v10 }
 0x2c3   : > { %2704 = vmatprep.subr.bf16.mxu0 %v2888_v11 }
 0x2c6   : > { %2705 = vmatpush3.bf16.msra.mxu0 %v2888_v11 }
 0x2c7   : > { %2706 = vmatprep.subr.bf16.mxu0 %v2889_v12 }
 0x2ca   : > { %2707 = vmatpush3.bf16.msra.mxu0 %v2889_v12 }
 0x2cd   : > { %2709 = vmatmul.mubr.bf16.vlgmr.msra.gmra.mxu0 %v1907_v14 }
 0x34d   : > { %v2630_v15 = vpop.f32.mrf.mxu0 }
 0x34e   : > { %v2650_v16 = vpop.f32.mrf.mxu1 }
 0x34f   : > { %v1551_v17 = vpop.f32.mrf.mxu0  ;;  %v1656_v29 = vadd.f32 %v2650_v16, %v2630_v15 }
 0x350   : > { %v1647_v18 = vpop.f32.mrf.mxu1 }
 0x351   : > { %v2631_v19 = vpop.f32.mrf.mxu0  ;;  %v1648_v30 = vadd.f32 %v1647_v18, %v1551_v17 }
 0x352   : > { %v2651_v20 = vpop.f32.mrf.mxu1 }
 0x353   : > { %v1554_v21 = vpop.f32.mrf.mxu0 }
 0x354   : > { %v1650_v22 = vpop.f32.mrf.mxu1 }
 0x355   : > { %v1651_v34 = vadd.f32 %v1650_v22, %v1554_v21 }
 0x36d   : > { %v2670_v23 = vpop.f32.mrf.mxu0 }
 0x36e   : > { %v2690_v24 = vpop.f32.mrf.mxu1  ;;  %v1781_v31 = vadd.f32 %v2670_v23, %v1656_v29 }
 0x36f   : > { %v1765_v25 = vpop.f32.mrf.mxu0 }
 0x370   : > { %v1886_v26 = vpop.f32.mrf.mxu1  ;;  %v1779_v32 = vadd.f32 %v1765_v25, %v1648_v30  ;;  %v1902_v35 = vadd.f32 %v2690_v24, %v1781_v31 }
 0x371   : > { %v2671_v27 = vpop.f32.mrf.mxu0 }
 0x372   : > { %v2691_v28 = vpop.f32.mrf.mxu1  ;;  %v1900_v38 = vadd.f32 %v1886_v26, %v1779_v32 }
 0x373   : > { %v1768_v33 = vpop.f32.mrf.mxu0 }
 0x374   : > { %v1780_v39 = vadd.f32 %v1768_v33, %v1651_v34  ;;  %v1889_v44 = vpop.f32.mrf.mxu1 }
 0x376   : > { %v1901_v46 = vadd.f32 %v1889_v44, %v1780_v39 }
 0x38d   : > { %v2710_v36 = vpop.f32.mrf.mxu0 }
 0x38e   : > { %v2023_v40 = vadd.f32 %v2710_v36, %v1902_v35 }
 0x38f   : > { %v2007_v41 = vpop.f32.mrf.mxu0 }
 0x390   : > { %v2031_v42 = vadd.f32 %v2258_v37, %v2023_v40  ;;  %v2021_v43 = vadd.f32 %v2007_v41, %v1900_v38 }
 0x391   : > { %v2711_v45 = vpop.f32.mrf.mxu0 }
 0x392   : > { %2034 = vst [vmem:[#allocation3 + $0x12] sm:$0xff] %v2031_v42  ;;  %v2029_v47 = vadd.f32 %v2258_v37, %v2021_v43  ;;  %2040 = vst [vmem:[%s178_s28 + $0x10] sm:$0xff] %v2031_v42 }
 0x393   : > { %v2010_v48 = vpop.f32.mrf.mxu0 }
 0x394   : > { %2032 = vst [vmem:[#allocation3 + $0x2] sm:$0xff] %v2029_v47  ;;  %v2022_v49 = vadd.f32 %v2010_v48, %v1901_v46  ;;  %2038 = vst [vmem:[%s178_s28] sm:$0xff] %v2029_v47 }
 0x396   : > { %v2030_v50 = vadd.f32 %v2258_v37, %v2022_v49 }
 0x398   : > { %2033 = vst [vmem:[#allocation3 + $0xa] sm:$0xff] %v2030_v50  ;;  %2039 = vst [vmem:[%s178_s28 + $0x8] sm:$0xff] %v2030_v50 }
 0x399   : > { %2941 = shalt.err (!%p2938_p0)
}
 0x39a   : > { %s2942_s10 = scalar_lea.hbm %s3134_s5, 384  ;;  %s2946_s19 = scalar_lea.hbm %s3183_s3, 768 }
 0x39b   : > { %p2943_p1 = scmp.ne.s32.totalorder %s3134_s5, %s2942_s10  ;;  %p2947_p4 = scmp.lt.s32.totalorder %s3134_s5, %s3183_s3 }
 0x39c   : > { %p2948_p7 = scmp.lt.s32.totalorder %s2946_s19, %s2942_s10 }
 0x39d   : > { %p2944_p2 = pnand %p2943_p1, %p3059_p5 }
 0x39e   : > { %p2949_p6 = por %p2948_p7, %p2947_p4 }
 0x39f   : > { %p2945_p3 = pneg %p2944_p2 }
 0x3a1   : > { %p2950_p8 = pnand %p2949_p6, %p2945_p3 }
 0x3a3   : > { %2953 = shalt.err (!%p2950_p8)
}
 0x3a4   : > { %s2999_s25 = smov 128   ;;  %s3000_s26 = smov 8  }
 0x3a5   : > { %2719 = dma.vmem_to_hbm [thread:$0]  (%p3059_p5), %s3136_s29, 384, %s3134_s5, %s3140_s16, %s2999_s25, %s2999_s25, %s3000_s26  }
 0x3a6 PF: > { %p2731_p9 = scmp.ge.s32.totalorder %s2992_s15, 2  ;;  %s2070_s27 = sand.u32 1, %s2980_s12  }
 0x3a7   : > { %p3187_p10 = scmp.ne.s32.totalorder %s3185_s23, 0  ;;  %s2071_s28 = scalar_lea.sflag [#allocation6], %s2070_s27 }
 0x3a9   : > { %p2726_p11 = pnand %p2731_p9, %p3187_p10 }
 0x3ab   : > { %p2727_p12 = pneg %p2726_p11 }
 0x3ad   : > { %2975 = dma.done.wait (%p2727_p12), %s2071_s28, 384  }
 0x3ae   : > { %2977 = vsyncadd (%p2727_p12), %s2071_s28, 4294966912  ;;  %p14_p13 = scmp.ge.s32.totalorder %s3046_s18, 4   ;;  %s3188_s12 = smov %s2984_s13 }
 0x3af   : > { %s3189_s13 = smov %s2988_s14  ;;  %s3190_s14 = smov %s3057_s21 }
 0x3b0   : > { %s3191_s15 = smov %s3046_s18  ;;  %16 = sbr.rel (!%p14_p13) target bundleno = 4 (0x4), region = 86 }
 0x3b5   :  { %2076 = vsyncpa [#allocation5], 1 }
 0x3b6   :  { %2078 = vsyncpa [#allocation5 + $0x1], 1 }
 0x3b7   :  { %2079 = vsyncpa [#allocation6], 1 }
 0x3b8   :  { %2081 = vsyncpa [#allocation6 + $0x1], 1 }

</bundles_post_ra>
